<compile_context>
chip_gen: v7x
topology: tpu7x:2x2x1
jax: 0.10.0
libtpu: 0.0.40
codegen_flags: <defaults>
</compile_context>

<pallas_src>
import functools

import jax
import jax.numpy as jnp
from jax import lax
from jax.experimental import pallas as pl
from jax.experimental.pallas import tpu as pltpu

INPUT_DIM = 3
HIDDEN_DIM = 64
NUM_HIDDEN_LAYERS = 4          # -> 5 Linear layers total
DEFAULT_TILE_M = 4096          # original-batch rows per grid step
PAD_QUANTUM = 512              # batch rows are padded up to a multiple of this


def _silu(z):
    # z * sigmoid(z); sigmoid written with tanh so each activation costs a
    # single EUP transcendental (and never overflows).
    return z * (0.5 * jnp.tanh(0.5 * z) + 0.5)


def opnn_kernel(x_ref,
                w0_ref, b0_ref,
                w1_ref, b1_ref,
                w2_ref, b2_ref,
                w3_ref, b3_ref,
                w4_ref, b4_ref,
                o_ref):
    """Whole MLP for one batch tile, in a 2-rows-per-activation-row packing.

    x_ref : (Tp, 8)  f32  row p = [x_{2p}(3), 0, x_{2p+1}(3), 0]
    o_ref : (8, Tp)  f32  row 0 = softplus(out) of even rows, row 1 = odd rows,
                          rows 2..7 = dead padding (sliced off in the wrapper).
    """
    # ---- Layer 0: Linear(3->64) for two batch rows at once on the MXU.
    # Weight is the 2-way block-diagonal, zero-padded to K=8; kept f32 so the
    # raw (S, K, T) inputs are not quantized before the first layer. ----
    z = jnp.dot(x_ref[...], w0_ref[...],
                preferred_element_type=jnp.float32) + b0_ref[...]
    h = _silu(z)                                            # (Tp, 128) f32

    # ---- Layers 1..3: Linear(64->64)+SiLU with blockdiag(W,W) (128,128) bf16
    # operands and f32 accumulation. Every vreg is lane-dense. ----
    for w_ref, b_ref in ((w1_ref, b1_ref), (w2_ref, b2_ref), (w3_ref, b3_ref)):
        z = jnp.dot(h.astype(jnp.bfloat16), w_ref[...],
                    preferred_element_type=jnp.float32) + b_ref[...]
        h = _silu(z)

    # ---- Output Linear(64->1): contract the packed hidden dim against an
    # (8, 128) selector (rows 0/1 hold w4 for the even/odd halves, rows 2..7
    # are zero) so the result comes out lane-dense as (8, Tp). ----
    out = lax.dot_general(
        w4_ref[...], h.astype(jnp.bfloat16),
        (((1,), (1,)), ((), ())),
        preferred_element_type=jnp.float32) + b4_ref[...]   # (8, Tp)

    # Numerically stable softplus, computed on the lane-dense layout.
    o_ref[...] = (jnp.maximum(out, 0.0)
                  + jnp.log(1.0 + jnp.exp(-jnp.abs(out)))).astype(o_ref.dtype)


def _round_up(a, b):
    return ((a + b - 1) // b) * b


@functools.partial(jax.jit, static_argnames=("tile_m",))
def opnn_forward(x, params, tile_m=DEFAULT_TILE_M):
    """params = (w0, b0, ..., w4, b4), all f32; weights stored (in, out)."""
    w0, b0, w1, b1, w2, b2, w3, b3, w4, b4 = params

    n = x.shape[0]
    n_pad = _round_up(max(n, 1), PAD_QUANTUM)           # small pad quantum
    tile = _round_up(min(tile_m, n_pad), 256)           # tile//2 % 128 == 0
    tile = min(tile, n_pad)
    tp = tile // 2                                       # packed rows per step
    np_pack = n_pad // 2                                 # packed rows total

    # Pack two consecutive batch rows per input row: (n,3) -> (n_pad//2, 8)
    # with layout [x_{2p}, 0, x_{2p+1}, 0].
    x_p = jnp.pad(x, ((0, n_pad - n), (0, 1)))
    x_p = x_p.reshape(np_pack, 8)

    # ---- Weight packing (block-diagonal 2-way). ----
    H = HIDDEN_DIM
    w0p = jnp.zeros((8, 2 * H), jnp.float32)
    w0p = w0p.at[:INPUT_DIM, :H].set(w0).at[4:4 + INPUT_DIM, H:].set(w0)
    b0p = jnp.tile(b0, (1, 2))                           # (1, 128) f32

    def bd(w):                                           # (64,64)->(128,128)
        z = jnp.zeros((2 * H, 2 * H), jnp.float32)
        return z.at[:H, :H].set(w).at[H:, H:].set(w)

    w1p = bd(w1).astype(jnp.bfloat16)
    w2p = bd(w2).astype(jnp.bfloat16)
    w3p = bd(w3).astype(jnp.bfloat16)
    b1p = jnp.tile(b1, (1, 2))
    b2p = jnp.tile(b2, (1, 2))
    b3p = jnp.tile(b3, (1, 2))

    # Output selector (8, 128): row 0 -> even rows, row 1 -> odd rows.
    w4p = jnp.zeros((8, 2 * H), jnp.float32)
    w4p = w4p.at[0, :H].set(w4[:, 0]).at[1, H:].set(w4[:, 0])
    w4p = w4p.astype(jnp.bfloat16)

    weights = (w0p, b0p, w1p, b1p, w2p, b2p, w3p, b3p, w4p, b4)

    grid = (pl.cdiv(np_pack, tp),)                       # ragged last block OK
    out = pl.pallas_call(
        opnn_kernel,
        out_shape=jax.ShapeDtypeStruct((8, np_pack), jnp.float32),
        grid=grid,
        in_specs=[pl.BlockSpec((tp, 8), lambda i: (i, 0))]
                + [pl.BlockSpec(p.shape, lambda i: (0, 0)) for p in weights],
        out_specs=pl.BlockSpec((8, tp), lambda i: (0, i)),
        compiler_params=pltpu.CompilerParams(
            dimension_semantics=("parallel",)),          # v7x: tiles over 2 TCs
    )(x_p, *weights)

    # Un-pack: out[0, p] = o_{2p}, out[1, p] = o_{2p+1}; rows 2..7 are padding.
    out = out[:2].T.reshape(n_pad, 1)
    return out[:n]


def init_params(key):
    """Xavier-normal weights, zero biases; weights stored as (in, out)."""
    dims = [INPUT_DIM] + [HIDDEN_DIM] * NUM_HIDDEN_LAYERS + [1]
    params = []
    keys = jax.random.split(key, len(dims) - 1)
    for k, fan_in, fan_out in zip(keys, dims[:-1], dims[1:]):
        std = jnp.sqrt(2.0 / (fan_in + fan_out))
        w = std * jax.random.normal(k, (fan_in, fan_out), dtype=jnp.float32)
        b = jnp.zeros((1, fan_out), dtype=jnp.float32)
        params.extend([w, b])
    return tuple(params)


def opnn_reference(x, params):
    """Plain-JAX f32 reference mirroring the PyTorch module."""
    h = x
    for i in range(NUM_HIDDEN_LAYERS):
        w, b = params[2 * i], params[2 * i + 1]
        h = jax.nn.silu(h @ w + b)
    w, b = params[-2], params[-1]
    return jax.nn.softplus(h @ w + b)


if __name__ == "__main__":
    key = jax.random.PRNGKey(0)
    kp, kx = jax.random.split(key)

    params = init_params(kp)

    batch = 8
    # (S, K, T)-like option-pricing inputs; small deterministic example.
    x = jax.random.uniform(kx, (batch, INPUT_DIM), dtype=jnp.float32)

    out = opnn_forward(x, params)
    out = jax.block_until_ready(out)

    ref = opnn_reference(x, params)
    assert out.shape == (batch, 1), out.shape
    max_err = float(jnp.max(jnp.abs(out - ref)))
    # bf16 hidden-layer matmul operands => small, bounded deviation from the
    # pure-f32 reference.
    assert max_err < 5e-2, ("mismatch vs reference", max_err, out, ref)

    print("KERNEL_OK")
</pallas_src>

<mosaic_0001>
module attributes {stable_mosaic.version = 11 : i64} {
  func.func @opnn_kernel(%arg0: i32, %arg1: memref<256x8xf32, #tpu.memory_space<vmem>>, %arg2: memref<8x128xf32, #tpu.memory_space<vmem>>, %arg3: memref<1x128xf32, #tpu.memory_space<vmem>>, %arg4: memref<128x128xbf16, #tpu.memory_space<vmem>>, %arg5: memref<1x128xf32, #tpu.memory_space<vmem>>, %arg6: memref<128x128xbf16, #tpu.memory_space<vmem>>, %arg7: memref<1x128xf32, #tpu.memory_space<vmem>>, %arg8: memref<128x128xbf16, #tpu.memory_space<vmem>>, %arg9: memref<1x128xf32, #tpu.memory_space<vmem>>, %arg10: memref<8x128xbf16, #tpu.memory_space<vmem>>, %arg11: memref<1x1xf32, #tpu.memory_space<vmem>>, %arg12: memref<8x256xf32, #tpu.memory_space<vmem>>) attributes {dimension_semantics = [#tpu.dimension_semantics<parallel>], iteration_bounds = array<i64: 1>, scalar_prefetch = 0 : i64, scratch_operands = 0 : i64, tpu.core_type = #tpu.core_type<tc>, window_params = [{transform_indices = @transform_0, window_bounds = array<i64: 256, 8>}, {pipeline_mode = #tpu.pipeline_mode<synchronous>, transform_indices = @transform_1, window_bounds = array<i64: 8, 128>}, {pipeline_mode = #tpu.pipeline_mode<synchronous>, transform_indices = @transform_2, window_bounds = array<i64: 1, 128>}, {pipeline_mode = #tpu.pipeline_mode<synchronous>, transform_indices = @transform_3, window_bounds = array<i64: 128, 128>}, {pipeline_mode = #tpu.pipeline_mode<synchronous>, transform_indices = @transform_4, window_bounds = array<i64: 1, 128>}, {pipeline_mode = #tpu.pipeline_mode<synchronous>, transform_indices = @transform_5, window_bounds = array<i64: 128, 128>}, {pipeline_mode = #tpu.pipeline_mode<synchronous>, transform_indices = @transform_6, window_bounds = array<i64: 1, 128>}, {pipeline_mode = #tpu.pipeline_mode<synchronous>, transform_indices = @transform_7, window_bounds = array<i64: 128, 128>}, {pipeline_mode = #tpu.pipeline_mode<synchronous>, transform_indices = @transform_8, window_bounds = array<i64: 1, 128>}, {pipeline_mode = #tpu.pipeline_mode<synchronous>, transform_indices = @transform_9, window_bounds = array<i64: 8, 128>}, {pipeline_mode = #tpu.pipeline_mode<synchronous>, transform_indices = @transform_10, window_bounds = array<i64: 1, 1>}, {transform_indices = @transform_11, window_bounds = array<i64: 8, 256>}]} {
    %c0 = arith.constant 0 : index
    %c0_0 = arith.constant 0 : index
    %0 = vector.load %arg1[%c0, %c0_0] : memref<256x8xf32, #tpu.memory_space<vmem>>, vector<256x8xf32>
    %c0_1 = arith.constant 0 : index
    %c0_2 = arith.constant 0 : index
    %1 = vector.load %arg2[%c0_1, %c0_2] : memref<8x128xf32, #tpu.memory_space<vmem>>, vector<8x128xf32>
    %cst = arith.constant dense<0.000000e+00> : vector<256x128xf32>
    %2 = tpu.matmul %0, %1, %cst {dimension_numbers = #tpu.dot_dimension_numbers<[1], [0], [0], [1], [0, 0, 1, 1], [], []>} : vector<256x8xf32>, vector<8x128xf32>, vector<256x128xf32> -> vector<256x128xf32>
    %c0_3 = arith.constant 0 : index
    %c0_4 = arith.constant 0 : index
    %3 = vector.load %arg3[%c0_3, %c0_4] : memref<1x128xf32, #tpu.memory_space<vmem>>, vector<1x128xf32>
    %4 = vector.broadcast %3 : vector<1x128xf32> to vector<256x128xf32>
    %5 = arith.addf %2, %4 : vector<256x128xf32>
    %cst_5 = arith.constant 5.000000e-01 : f32
    %6 = vector.broadcast %cst_5 : f32 to vector<256x128xf32>
    %7 = arith.mulf %6, %5 : vector<256x128xf32>
    %8 = math.tanh %7 : vector<256x128xf32>
    %cst_6 = arith.constant 5.000000e-01 : f32
    %9 = vector.broadcast %cst_6 : f32 to vector<256x128xf32>
    %10 = arith.mulf %9, %8 : vector<256x128xf32>
    %cst_7 = arith.constant 5.000000e-01 : f32
    %11 = vector.broadcast %cst_7 : f32 to vector<256x128xf32>
    %12 = arith.addf %10, %11 : vector<256x128xf32>
    %13 = arith.mulf %5, %12 : vector<256x128xf32>
    %14 = arith.truncf %13 : vector<256x128xf32> to vector<256x128xbf16>
    %c0_8 = arith.constant 0 : index
    %c0_9 = arith.constant 0 : index
    %15 = vector.load %arg4[%c0_8, %c0_9] : memref<128x128xbf16, #tpu.memory_space<vmem>>, vector<128x128xbf16>
    %cst_10 = arith.constant dense<0.000000e+00> : vector<256x128xf32>
    %16 = tpu.matmul %14, %15, %cst_10 {dimension_numbers = #tpu.dot_dimension_numbers<[1], [0], [0], [1], [0, 0, 1, 1], [], []>} : vector<256x128xbf16>, vector<128x128xbf16>, vector<256x128xf32> -> vector<256x128xf32>
    %c0_11 = arith.constant 0 : index
    %c0_12 = arith.constant 0 : index
    %17 = vector.load %arg5[%c0_11, %c0_12] : memref<1x128xf32, #tpu.memory_space<vmem>>, vector<1x128xf32>
    %18 = vector.broadcast %17 : vector<1x128xf32> to vector<256x128xf32>
    %19 = arith.addf %16, %18 : vector<256x128xf32>
    %cst_13 = arith.constant 5.000000e-01 : f32
    %20 = vector.broadcast %cst_13 : f32 to vector<256x128xf32>
    %21 = arith.mulf %20, %19 : vector<256x128xf32>
    %22 = math.tanh %21 : vector<256x128xf32>
    %cst_14 = arith.constant 5.000000e-01 : f32
    %23 = vector.broadcast %cst_14 : f32 to vector<256x128xf32>
    %24 = arith.mulf %23, %22 : vector<256x128xf32>
    %cst_15 = arith.constant 5.000000e-01 : f32
    %25 = vector.broadcast %cst_15 : f32 to vector<256x128xf32>
    %26 = arith.addf %24, %25 : vector<256x128xf32>
    %27 = arith.mulf %19, %26 : vector<256x128xf32>
    %28 = arith.truncf %27 : vector<256x128xf32> to vector<256x128xbf16>
    %c0_16 = arith.constant 0 : index
    %c0_17 = arith.constant 0 : index
    %29 = vector.load %arg6[%c0_16, %c0_17] : memref<128x128xbf16, #tpu.memory_space<vmem>>, vector<128x128xbf16>
    %cst_18 = arith.constant dense<0.000000e+00> : vector<256x128xf32>
    %30 = tpu.matmul %28, %29, %cst_18 {dimension_numbers = #tpu.dot_dimension_numbers<[1], [0], [0], [1], [0, 0, 1, 1], [], []>} : vector<256x128xbf16>, vector<128x128xbf16>, vector<256x128xf32> -> vector<256x128xf32>
    %c0_19 = arith.constant 0 : index
    %c0_20 = arith.constant 0 : index
    %31 = vector.load %arg7[%c0_19, %c0_20] : memref<1x128xf32, #tpu.memory_space<vmem>>, vector<1x128xf32>
    %32 = vector.broadcast %31 : vector<1x128xf32> to vector<256x128xf32>
    %33 = arith.addf %30, %32 : vector<256x128xf32>
    %cst_21 = arith.constant 5.000000e-01 : f32
    %34 = vector.broadcast %cst_21 : f32 to vector<256x128xf32>
    %35 = arith.mulf %34, %33 : vector<256x128xf32>
    %36 = math.tanh %35 : vector<256x128xf32>
    %cst_22 = arith.constant 5.000000e-01 : f32
    %37 = vector.broadcast %cst_22 : f32 to vector<256x128xf32>
    %38 = arith.mulf %37, %36 : vector<256x128xf32>
    %cst_23 = arith.constant 5.000000e-01 : f32
    %39 = vector.broadcast %cst_23 : f32 to vector<256x128xf32>
    %40 = arith.addf %38, %39 : vector<256x128xf32>
    %41 = arith.mulf %33, %40 : vector<256x128xf32>
    %42 = arith.truncf %41 : vector<256x128xf32> to vector<256x128xbf16>
    %c0_24 = arith.constant 0 : index
    %c0_25 = arith.constant 0 : index
    %43 = vector.load %arg8[%c0_24, %c0_25] : memref<128x128xbf16, #tpu.memory_space<vmem>>, vector<128x128xbf16>
    %cst_26 = arith.constant dense<0.000000e+00> : vector<256x128xf32>
    %44 = tpu.matmul %42, %43, %cst_26 {dimension_numbers = #tpu.dot_dimension_numbers<[1], [0], [0], [1], [0, 0, 1, 1], [], []>} : vector<256x128xbf16>, vector<128x128xbf16>, vector<256x128xf32> -> vector<256x128xf32>
    %c0_27 = arith.constant 0 : index
    %c0_28 = arith.constant 0 : index
    %45 = vector.load %arg9[%c0_27, %c0_28] : memref<1x128xf32, #tpu.memory_space<vmem>>, vector<1x128xf32>
    %46 = vector.broadcast %45 : vector<1x128xf32> to vector<256x128xf32>
    %47 = arith.addf %44, %46 : vector<256x128xf32>
    %cst_29 = arith.constant 5.000000e-01 : f32
    %48 = vector.broadcast %cst_29 : f32 to vector<256x128xf32>
    %49 = arith.mulf %48, %47 : vector<256x128xf32>
    %50 = math.tanh %49 : vector<256x128xf32>
    %cst_30 = arith.constant 5.000000e-01 : f32
    %51 = vector.broadcast %cst_30 : f32 to vector<256x128xf32>
    %52 = arith.mulf %51, %50 : vector<256x128xf32>
    %cst_31 = arith.constant 5.000000e-01 : f32
    %53 = vector.broadcast %cst_31 : f32 to vector<256x128xf32>
    %54 = arith.addf %52, %53 : vector<256x128xf32>
    %55 = arith.mulf %47, %54 : vector<256x128xf32>
    %c0_32 = arith.constant 0 : index
    %c0_33 = arith.constant 0 : index
    %56 = vector.load %arg10[%c0_32, %c0_33] : memref<8x128xbf16, #tpu.memory_space<vmem>>, vector<8x128xbf16>
    %57 = arith.truncf %55 : vector<256x128xf32> to vector<256x128xbf16>
    %cst_34 = arith.constant dense<0.000000e+00> : vector<8x256xf32>
    %58 = tpu.matmul %56, %57, %cst_34 {dimension_numbers = #tpu.dot_dimension_numbers<[1], [1], [0], [0], [0, 0, 1, 0], [], []>} : vector<8x128xbf16>, vector<256x128xbf16>, vector<8x256xf32> -> vector<8x256xf32>
    %c0_35 = arith.constant 0 : index
    %c0_36 = arith.constant 0 : index
    %59 = vector.load %arg11[%c0_35, %c0_36] : memref<1x1xf32, #tpu.memory_space<vmem>>, vector<1x1xf32>
    %60 = vector.broadcast %59 : vector<1x1xf32> to vector<8x256xf32>
    %61 = arith.addf %58, %60 : vector<8x256xf32>
    %cst_37 = arith.constant 0.000000e+00 : f32
    %62 = vector.broadcast %cst_37 : f32 to vector<8x256xf32>
    %63 = arith.maximumf %61, %62 : vector<8x256xf32>
    %64 = math.absf %61 : vector<8x256xf32>
    %cst_38 = arith.constant 0.000000e+00 : f32
    %65 = vector.broadcast %cst_38 : f32 to vector<8x256xf32>
    %66 = arith.subf %65, %64 : vector<8x256xf32>
    %67 = math.exp %66 : vector<8x256xf32>
    %cst_39 = arith.constant 1.000000e+00 : f32
    %68 = vector.broadcast %cst_39 : f32 to vector<8x256xf32>
    %69 = arith.addf %68, %67 : vector<8x256xf32>
    %70 = math.log %69 : vector<8x256xf32>
    %71 = arith.addf %63, %70 : vector<8x256xf32>
    %c0_40 = arith.constant 0 : index
    %c0_41 = arith.constant 0 : index
    %72 = vector.load %arg12[%c0_40, %c0_41] : memref<8x256xf32, #tpu.memory_space<vmem>>, vector<8x256xf32>
    tpu.vector_store %arg12[%c0_40, %c0_41], %71 {strides = array<i32>} : memref<8x256xf32, #tpu.memory_space<vmem>>, vector<8x256xf32>,
    return
  }
  func.func @transform_0(%arg0: i32) -> (i32, i32) {
    %c0_i32 = arith.constant 0 : i32
    %c0_i32_0 = arith.constant 0 : i32
    return %arg0, %c0_i32 : i32, i32
  }
  func.func @transform_1(%arg0: i32) -> (i32, i32) {
    %c0_i32 = arith.constant 0 : i32
    %c0_i32_0 = arith.constant 0 : i32
    %c0_i32_1 = arith.constant 0 : i32
    return %c0_i32, %c0_i32_0 : i32, i32
  }
  func.func @transform_2(%arg0: i32) -> (i32, i32) {
    %c0_i32 = arith.constant 0 : i32
    %c0_i32_0 = arith.constant 0 : i32
    %c0_i32_1 = arith.constant 0 : i32
    return %c0_i32, %c0_i32_0 : i32, i32
  }
  func.func @transform_3(%arg0: i32) -> (i32, i32) {
    %c0_i32 = arith.constant 0 : i32
    %c0_i32_0 = arith.constant 0 : i32
    %c0_i32_1 = arith.constant 0 : i32
    return %c0_i32, %c0_i32_0 : i32, i32
  }
  func.func @transform_4(%arg0: i32) -> (i32, i32) {
    %c0_i32 = arith.constant 0 : i32
    %c0_i32_0 = arith.constant 0 : i32
    %c0_i32_1 = arith.constant 0 : i32
    return %c0_i32, %c0_i32_0 : i32, i32
  }
  func.func @transform_5(%arg0: i32) -> (i32, i32) {
    %c0_i32 = arith.constant 0 : i32
    %c0_i32_0 = arith.constant 0 : i32
    %c0_i32_1 = arith.constant 0 : i32
    return %c0_i32, %c0_i32_0 : i32, i32
  }
  func.func @transform_6(%arg0: i32) -> (i32, i32) {
    %c0_i32 = arith.constant 0 : i32
    %c0_i32_0 = arith.constant 0 : i32
    %c0_i32_1 = arith.constant 0 : i32
    return %c0_i32, %c0_i32_0 : i32, i32
  }
  func.func @transform_7(%arg0: i32) -> (i32, i32) {
    %c0_i32 = arith.constant 0 : i32
    %c0_i32_0 = arith.constant 0 : i32
    %c0_i32_1 = arith.constant 0 : i32
    return %c0_i32, %c0_i32_0 : i32, i32
  }
  func.func @transform_8(%arg0: i32) -> (i32, i32) {
    %c0_i32 = arith.constant 0 : i32
    %c0_i32_0 = arith.constant 0 : i32
    %c0_i32_1 = arith.constant 0 : i32
    return %c0_i32, %c0_i32_0 : i32, i32
  }
  func.func @transform_9(%arg0: i32) -> (i32, i32) {
    %c0_i32 = arith.constant 0 : i32
    %c0_i32_0 = arith.constant 0 : i32
    %c0_i32_1 = arith.constant 0 : i32
    return %c0_i32, %c0_i32_0 : i32, i32
  }
  func.func @transform_10(%arg0: i32) -> (i32, i32) {
    %c0_i32 = arith.constant 0 : i32
    %c0_i32_0 = arith.constant 0 : i32
    %c0_i32_1 = arith.constant 0 : i32
    return %c0_i32, %c0_i32_0 : i32, i32
  }
  func.func @transform_11(%arg0: i32) -> (i32, i32) {
    %c0_i32 = arith.constant 0 : i32
    %c0_i32_0 = arith.constant 0 : i32
    return %c0_i32, %arg0 : i32, i32
  }
}

</mosaic_0001>

<bundles_post_ra>
// kernel: opnn_forward.1
= control target key start
LH: loop header
LB: loop body
LE: loop exit
PB: predicated region body
PF: predicated region fallthrough
CT: control target
= control target key end

     0   :  { %vm81_vm0 = vcmask 64512   ;;  %s3443_s1 = inlined_call_operand.vmem [shape: f32[8,128], index: 1, kind: input, shape index: {}]   ;;  %s3444_s0 = inlined_call_operand.vmem [shape: f32[256,8], index: 0, kind: input, shape index: {}]   ;;  %s3445_s3 = inlined_call_operand.vmem [shape: bf16[128,128], index: 3, kind: input, shape index: {}]   ;;  %s3446_s5 = inlined_call_operand.vmem [shape: bf16[128,128], index: 5, kind: input, shape index: {}]   ;;  %s3447_s2 = inlined_call_operand.vmem [shape: f32[1,128], index: 2, kind: input, shape index: {}]   ;;  %s3448_s7 = inlined_call_operand.vmem [shape: bf16[128,128], index: 7, kind: input, shape index: {}]   ;;  %s3449_s4 = inlined_call_operand.vmem [shape: f32[1,128], index: 4, kind: input, shape index: {}]   ;;  %s3450_s6 = inlined_call_operand.vmem [shape: f32[1,128], index: 6, kind: input, shape index: {}]   ;;  %s3451_s9 = inlined_call_operand.vmem [shape: bf16[8,128], index: 9, kind: input, shape index: {}]   ;;  %s3452_s8 = inlined_call_operand.vmem [shape: f32[1,128], index: 8, kind: input, shape index: {}]   ;;  %s3453_s10 = inlined_call_operand.<no memory space> [shape: f32[1,1], index: 10, kind: input, shape index: {}]   ;;  %s3454_s11 = inlined_call_operand.vmem [shape: f32[8,256], index: 11, kind: output, shape index: {}]  }
   0x1   :  { %v73_v0 = vld [vmem:[%s3443_s1] sm:$0xff]  ;;  %v42_v2 = vld [vmem:[%s3444_s0 + $0x8] sm:$0xff]  ;;  %v43_v3 = vld [vmem:[%s3444_s0 + $0x10] sm:$0xff] }
   0x2   :  { %v41_v1 = vld [vmem:[%s3444_s0] sm:$0xff]  ;;  %2063 = vmatprep.subr.mxu0 %v73_v0  ;;  %v44_v4 = vld [vmem:[%s3444_s0 + $0x18] sm:$0xff]  ;;  %v46_v6 = vld [vmem:[%s3444_s0 + $0x28] sm:$0xff] }
   0x3   :  { %2065 = vmatprep.mubr.msk.f32.mxu0 %vm81_vm0, %v41_v1  ;;  %2064 = vmatpush3.msra.mxu0 %v73_v0  ;;  %v45_v5 = vld [vmem:[%s3444_s0 + $0x20] sm:$0xff]  ;;  %v47_v7 = vld [vmem:[%s3444_s0 + $0x30] sm:$0xff]  ;;  %v48_v8 = vld [vmem:[%s3444_s0 + $0x38] sm:$0xff] }
   0x4   :  { %2066 = vmatmul.mubr.msk.f32.vlgmr.msra.gmra.mrb[0].mxu0 %vm81_vm0, %v42_v2  ;;  %v49_v9 = vld [vmem:[%s3444_s0 + $0x40] sm:$0xff]  ;;  %v50_v11 = vld [vmem:[%s3444_s0 + $0x48] sm:$0xff]  ;;  %v51_v12 = vld [vmem:[%s3444_s0 + $0x50] sm:$0xff] }
   0x5   :  { %2068 = vmatprep.mubr.msk.f32.mxu0 %vm81_vm0, %v43_v3  ;;  %v2259_v10 = vld [vmem:[%s3445_s3] sm:$0xff]   ;;  %v52_v13 = vld [vmem:[%s3444_s0 + $0x58] sm:$0xff]  ;;  %v54_v15 = vld [vmem:[%s3444_s0 + $0x68] sm:$0xff] }
   0x6   :  { %2113 = vmatprep.subr.bf16.mxu1 %v2259_v10  ;;  %v53_v14 = vld [vmem:[%s3444_s0 + $0x60] sm:$0xff]  ;;  %v55_v16 = vld [vmem:[%s3444_s0 + $0x70] sm:$0xff]  ;;  %v56_v17 = vld [vmem:[%s3444_s0 + $0x78] sm:$0xff] }
   0x7   :  { %2114 = vmatpush3.bf16.msra.mxu1 %v2259_v10  ;;  %v57_v18 = vld [vmem:[%s3444_s0 + $0x80] sm:$0xff]  ;;  %v58_v19 = vld [vmem:[%s3444_s0 + $0x88] sm:$0xff]  ;;  %v59_v20 = vld [vmem:[%s3444_s0 + $0x90] sm:$0xff] }
   0x8   :  { %2069 = vmatmul.mubr.msk.f32.gmra.mrb[2].mxu0 %vm81_vm0, %v44_v4  ;;  %v60_v21 = vld [vmem:[%s3444_s0 + $0x98] sm:$0xff]  ;;  %v61_v22 = vld [vmem:[%s3444_s0 + $0xa0] sm:$0xff]  ;;  %v62_v23 = vld [vmem:[%s3444_s0 + $0xa8] sm:$0xff] }
   0x9   :  { %2071 = vmatprep.mubr.msk.f32.mxu0 %vm81_vm0, %v45_v5  ;;  %v63_v24 = vld [vmem:[%s3444_s0 + $0xb0] sm:$0xff]  ;;  %v64_v25 = vld [vmem:[%s3444_s0 + $0xb8] sm:$0xff]  ;;  %v65_v26 = vld [vmem:[%s3444_s0 + $0xc0] sm:$0xff] }
   0xa   :  { %v66_v27 = vld [vmem:[%s3444_s0 + $0xc8] sm:$0xff]  ;;  %v67_v28 = vld [vmem:[%s3444_s0 + $0xd0] sm:$0xff]  ;;  %v68_v29 = vld [vmem:[%s3444_s0 + $0xd8] sm:$0xff] }
   0xb   :  { %v69_v30 = vld [vmem:[%s3444_s0 + $0xe0] sm:$0xff]  ;;  %v70_v31 = vld [vmem:[%s3444_s0 + $0xe8] sm:$0xff]  ;;  %v71_v32 = vld [vmem:[%s3444_s0 + $0xf0] sm:$0xff] }
   0xc   :  { %2072 = vmatmul.mubr.msk.f32.gmra.mrb[4].mxu0 %vm81_vm0, %v46_v6  ;;  %v72_v33 = vld [vmem:[%s3444_s0 + $0xf8] sm:$0xff]  ;;  %v2260_v34 = vld [vmem:[%s3445_s3 + $0x8] sm:$0xff]   ;;  %v2261_v35 = vld [vmem:[%s3445_s3 + $0x10] sm:$0xff]  }
   0xd   :  { %2074 = vmatprep.mubr.msk.f32.mxu0 %vm81_vm0, %v47_v7  ;;  %2115 = vmatprep.subr.bf16.mxu1 %v2260_v34  ;;  %v2262_v36 = vld [vmem:[%s3445_s3 + $0x18] sm:$0xff]   ;;  %v2263_v37 = vld [vmem:[%s3445_s3 + $0x20] sm:$0xff]   ;;  %v2264_v38 = vld [vmem:[%s3445_s3 + $0x28] sm:$0xff]  }
   0xe   :  { %2116 = vmatpush3.bf16.msra.mxu1 %v2260_v34  ;;  %v2265_v39 = vld [vmem:[%s3445_s3 + $0x30] sm:$0xff]   ;;  %v2266_v40 = vld [vmem:[%s3445_s3 + $0x38] sm:$0xff]   ;;  %v2267_v41 = vld [vmem:[%s3446_s5] sm:$0xff]  }
   0xf   :  { %2117 = vmatprep.subr.bf16.mxu1 %v2261_v35  ;;  %v2268_v42 = vld [vmem:[%s3446_s5 + $0x8] sm:$0xff]   ;;  %2161 = vmatprep.subr.bf16.mxu0 %v2267_v41  ;;  %v2269_v43 = vld [vmem:[%s3446_s5 + $0x10] sm:$0xff]   ;;  %v2270_v44 = vld [vmem:[%s3446_s5 + $0x18] sm:$0xff]  }
  0x10   :  { %2075 = vmatmul.mubr.msk.f32.gmra.mrb[6].mxu0 %vm81_vm0, %v48_v8  ;;  %v2271_v45 = vld [vmem:[%s3446_s5 + $0x20] sm:$0xff]  }
  0x11   :  { %2077 = vmatprep.mubr.msk.f32.mxu0 %vm81_vm0, %v49_v9  ;;  %2162 = vmatpush3.bf16.msra.mxu0 %v2267_v41  ;;  %v2781_v46 = vld [vmem:[%s3447_s2] ss:$0 sm:$0xff] }
  0x12   :  { %2118 = vmatpush3.bf16.msra.mxu1 %v2261_v35  ;;  %2163 = vmatprep.subr.bf16.mxu0 %v2268_v42 }
  0x13   :  { %2119 = vmatprep.subr.bf16.mxu1 %v2262_v36 }
  0x14   :  { %2078 = vmatmul.mubr.msk.f32.gmra.mrb[8].mxu0 %vm81_vm0, %v50_v11 }
  0x15   :  { %2080 = vmatprep.mubr.msk.f32.mxu0 %vm81_vm0, %v51_v12  ;;  %2164 = vmatpush3.bf16.msra.mxu0 %v2268_v42 }
  0x16   :  { %2120 = vmatpush3.bf16.msra.mxu1 %v2262_v36  ;;  %2165 = vmatprep.subr.bf16.mxu0 %v2269_v43 }
  0x17   :  { %2121 = vmatprep.subr.bf16.mxu1 %v2263_v37 }
  0x18   :  { %2081 = vmatmul.mubr.msk.f32.gmra.mrb[10].mxu0 %vm81_vm0, %v52_v13 }
  0x19   :  { %2083 = vmatprep.mubr.msk.f32.mxu0 %vm81_vm0, %v53_v14  ;;  %2166 = vmatpush3.bf16.msra.mxu0 %v2269_v43 }
  0x1a   :  { %2122 = vmatpush3.bf16.msra.mxu1 %v2263_v37  ;;  %2167 = vmatprep.subr.bf16.mxu0 %v2270_v44 }
  0x1b   :  { %2123 = vmatprep.subr.bf16.mxu1 %v2264_v38 }
  0x1c   :  { %2084 = vmatmul.mubr.msk.f32.gmra.mrb[12].mxu0 %vm81_vm0, %v54_v15 }
  0x1d   :  { %2086 = vmatprep.mubr.msk.f32.mxu0 %vm81_vm0, %v55_v16  ;;  %2168 = vmatpush3.bf16.msra.mxu0 %v2270_v44 }
  0x1e   :  { %2124 = vmatpush3.bf16.msra.mxu1 %v2264_v38  ;;  %2169 = vmatprep.subr.bf16.mxu0 %v2271_v45 }
  0x1f   :  { %2125 = vmatprep.subr.bf16.mxu1 %v2265_v39 }
  0x20   :  { %2087 = vmatmul.mubr.msk.f32.gmra.mrb[14].mxu0 %vm81_vm0, %v56_v17 }
  0x21   :  { %2089 = vmatprep.mubr.msk.f32.mxu0 %vm81_vm0, %v57_v18  ;;  %2170 = vmatpush3.bf16.msra.mxu0 %v2271_v45 }
  0x22   :  { %2126 = vmatpush3.bf16.msra.mxu1 %v2265_v39 }
  0x23   :  { %2127 = vmatprep.subr.bf16.mxu1 %v2266_v40 }
  0x24   :  { %2090 = vmatmul.mubr.msk.f32.gmra.mrb[16].mxu0 %vm81_vm0, %v58_v19 }
  0x25   :  { %2092 = vmatprep.mubr.msk.f32.mxu0 %vm81_vm0, %v59_v20 }
  0x26   :  { %2128 = vmatpush3.bf16.msra.mxu1 %v2266_v40 }
  0x28   :  { %2093 = vmatmul.mubr.msk.f32.gmra.mrb[18].mxu0 %vm81_vm0, %v60_v21 }
  0x29   :  { %2095 = vmatprep.mubr.msk.f32.mxu0 %vm81_vm0, %v61_v22 }
  0x2c   :  { %2096 = vmatmul.mubr.msk.f32.gmra.mrb[20].mxu0 %vm81_vm0, %v62_v23 }
  0x2d   :  { %2098 = vmatprep.mubr.msk.f32.mxu0 %vm81_vm0, %v63_v24 }
  0x30   :  { %2099 = vmatmul.mubr.msk.f32.gmra.mrb[22].mxu0 %vm81_vm0, %v64_v25 }
  0x31   :  { %2101 = vmatprep.mubr.msk.f32.mxu0 %vm81_vm0, %v65_v26 }
  0x34   :  { %2102 = vmatmul.mubr.msk.f32.gmra.mrb[24].mxu0 %vm81_vm0, %v66_v27 }
  0x35   :  { %2104 = vmatprep.mubr.msk.f32.mxu0 %vm81_vm0, %v67_v28 }
  0x38   :  { %2105 = vmatmul.mubr.msk.f32.gmra.mrb[26].mxu0 %vm81_vm0, %v68_v29 }
  0x39   :  { %2107 = vmatprep.mubr.msk.f32.mxu0 %vm81_vm0, %v69_v30 }
  0x3c   :  { %2108 = vmatmul.mubr.msk.f32.gmra.mrb[28].mxu0 %vm81_vm0, %v70_v31 }
  0x3d   :  { %2110 = vmatprep.mubr.msk.f32.mxu0 %vm81_vm0, %v71_v32 }
  0x40   :  { %2111 = vmatmul.mubr.msk.f32.gmra.mrb[30].mxu0 %vm81_vm0, %v72_v33 }
  0xd7   :  { %v2067_v47 = vpop.f32.mrb[0].mxu0 }
  0xd8   :  { %v250_v48 = vadd.f32 %v2067_v47, %v2781_v46  ;;  %v244_v49 = vpop.f32.mrb[1].mxu0 }
  0xd9   :  { %v245_v50 = vadd.f32 %v2781_v46, %v244_v49 }
  0xda   :  { %v404_v51 = vmul.f32 0.5, %v250_v48 }
  0xdb   :  { %v403_v52 = vmul.f32 0.5, %v245_v50  ;;  %v2070_v53 = vpop.f32.mrb[2].mxu0 }
  0xdc   :  { %2283 = vtanh.f32 %v404_v51  ;;  %v260_v54 = vadd.f32 %v2070_v53, %v2781_v46  ;;  %v254_v55 = vpop.f32.mrb[3].mxu0 }
  0xdd   :  { %2285 = vtanh.f32 %v403_v52  ;;  %v255_v56 = vadd.f32 %v2781_v46, %v254_v55 }
  0xde   :  { %v406_v57 = vmul.f32 0.5, %v260_v54 }
  0xdf   :  { %v405_v58 = vmul.f32 0.5, %v255_v56  ;;  %v2073_v59 = vpop.f32.mrb[4].mxu0 }
  0xe0   :  { %2287 = vtanh.f32 %v406_v57  ;;  %v2788_v60 = vadd.f32 %v2073_v59, %v2781_v46  ;;  %v264_v61 = vpop.f32.mrb[5].mxu0 }
  0xe1   :  { %2289 = vtanh.f32 %v405_v58  ;;  %v2791_v62 = vadd.f32 %v2781_v46, %v264_v61 }
  0xe2   :  { %v408_v63 = vmul.f32 0.5, %v2788_v60 }
  0xe3   :  { %v407_v0 = vmul.f32 0.5, %v2791_v62  ;;  %v2076_v1 = vpop.f32.mrb[6].mxu0 }
  0xe4   :  { %2291 = vtanh.f32 %v408_v63  ;;  %v2796_v2 = vadd.f32 %v2076_v1, %v2781_v46  ;;  %v274_v3 = vpop.f32.mrb[7].mxu0 }
  0xe5   :  { %2293 = vtanh.f32 %v407_v0  ;;  %v2799_v4 = vadd.f32 %v2781_v46, %v274_v3 }
  0xe6   :  { %v2284_v5 = vpop.eup %2283  ;;  %v410_v6 = vmul.f32 0.5, %v2796_v2 }
  0xe7   :  { %v2286_v7 = vpop.eup %2285  ;;  %v409_v8 = vmul.f32 0.5, %v2799_v4  ;;  %v2079_v9 = vpop.f32.mrb[8].mxu0  ;;  %v468_v10 = vmul.f32 0.5, %v2284_v5 }
  0xe8   :  { %2295 = vtanh.f32 %v410_v6  ;;  %v2804_v11 = vadd.f32 %v2079_v9, %v2781_v46  ;;  %v284_v12 = vpop.f32.mrb[9].mxu0  ;;  %v467_v13 = vmul.f32 0.5, %v2286_v7 }
  0xe9   :  { %2297 = vtanh.f32 %v409_v8  ;;  %v2807_v14 = vadd.f32 %v2781_v46, %v284_v12  ;;  %v500_v15 = vadd.f32 0.5, %v468_v10 }
  0xea   :  { %v2288_v16 = vpop.eup %2287  ;;  %v412_v17 = vmul.f32 0.5, %v2804_v11  ;;  %v499_v18 = vadd.f32 0.5, %v467_v13 }
  0xeb   :  { %v2290_v19 = vpop.eup %2289  ;;  %v470_v20 = vmul.f32 0.5, %v2288_v16  ;;  %v411_v21 = vmul.f32 0.5, %v2807_v14  ;;  %v2082_v22 = vpop.f32.mrb[10].mxu0  ;;  %v532_v23 = vmul.f32 %v500_v15, %v250_v48 }
  0xec   :  { %v469_v24 = vmul.f32 0.5, %v2290_v19  ;;  %2299 = vtanh.f32 %v412_v17  ;;  %v2812_v25 = vadd.f32 %v2082_v22, %v2781_v46  ;;  %v294_v26 = vpop.f32.mrb[11].mxu0  ;;  %v531_v27 = vmul.f32 %v499_v18, %v245_v50 }
  0xed   :  { %v502_v28 = vadd.f32 0.5, %v470_v20  ;;  %2301 = vtanh.f32 %v411_v21  ;;  %v2815_v29 = vadd.f32 %v2781_v46, %v294_v26 }
  0xee   :  { %v2292_v30 = vpop.eup %2291  ;;  %v501_v31 = vadd.f32 0.5, %v469_v24  ;;  %v414_v32 = vmul.f32 0.5, %v2812_v25  ;;  %v563_v33 = vpack.c.bf16 %v532_v23, %v531_v27 }
  0xef   :  { %v2294_v34 = vpop.eup %2293  ;;  %v534_v35 = vmul.f32 %v502_v28, %v260_v54  ;;  %v472_v36 = vmul.f32 0.5, %v2292_v30  ;;  %v413_v37 = vmul.f32 0.5, %v2815_v29  ;;  %v2085_v38 = vpop.f32.mrb[12].mxu0 }
  0xf0   :  { %v533_v39 = vmul.f32 %v501_v31, %v255_v56  ;;  %v471_v40 = vmul.f32 0.5, %v2294_v34  ;;  %2303 = vtanh.f32 %v414_v32  ;;  %v2820_v41 = vadd.f32 %v2085_v38, %v2781_v46  ;;  %v304_v42 = vpop.f32.mrb[13].mxu0  ;;  %2129 = vmatprep.mubr.bf16.mxu1 %v563_v33 }
  0xf1   :  { %v504_v43 = vadd.f32 0.5, %v472_v36  ;;  %2305 = vtanh.f32 %v413_v37  ;;  %v2823_v44 = vadd.f32 %v2781_v46, %v304_v42 }
  0xf2   :  { %v2296_v45 = vpop.eup %2295  ;;  %v503_v47 = vadd.f32 0.5, %v471_v40  ;;  %v416_v48 = vmul.f32 0.5, %v2820_v41  ;;  %v564_v49 = vpack.c.bf16 %v534_v35, %v533_v39 }
  0xf3   :  { %v2298_v50 = vpop.eup %2297  ;;  %v536_v51 = vmul.f32 %v504_v43, %v2788_v60  ;;  %v474_v52 = vmul.f32 0.5, %v2296_v45  ;;  %v415_v53 = vmul.f32 0.5, %v2823_v44  ;;  %v2088_v54 = vpop.f32.mrb[14].mxu0 }
  0xf4   :  { %v535_v55 = vmul.f32 %v503_v47, %v2791_v62  ;;  %v473_v56 = vmul.f32 0.5, %v2298_v50  ;;  %2307 = vtanh.f32 %v416_v48  ;;  %v2830_v57 = vadd.f32 %v2088_v54, %v2781_v46  ;;  %v314_v58 = vpop.f32.mrb[15].mxu0  ;;  %2130 = vmatmul.mubr.bf16.vlgmr.msra.gmra.mrb[0].mxu1 %v564_v49 }
  0xf5   :  { %v506_v59 = vadd.f32 0.5, %v474_v52  ;;  %2309 = vtanh.f32 %v415_v53  ;;  %v2833_v61 = vadd.f32 %v2781_v46, %v314_v58 }
  0xf6   :  { %v2300_v63 = vpop.eup %2299  ;;  %v505_v60 = vadd.f32 0.5, %v473_v56  ;;  %v418_v0 = vmul.f32 0.5, %v2830_v57  ;;  %v565_v1 = vpack.c.bf16 %v536_v51, %v535_v55 }
  0xf7   :  { %v2302_v3 = vpop.eup %2301  ;;  %v538_v62 = vmul.f32 %v506_v59, %v2796_v2  ;;  %v476_v5 = vmul.f32 0.5, %v2300_v63  ;;  %v417_v6 = vmul.f32 0.5, %v2833_v61  ;;  %v2091_v7 = vpop.f32.mrb[16].mxu0 }
  0xf8   :  { %v537_v8 = vmul.f32 %v505_v60, %v2799_v4  ;;  %v475_v9 = vmul.f32 0.5, %v2302_v3  ;;  %2311 = vtanh.f32 %v418_v0  ;;  %v2840_v10 = vadd.f32 %v2091_v7, %v2781_v46  ;;  %v324_v12 = vpop.f32.mrb[17].mxu0  ;;  %2133 = vmatprep.mubr.bf16.mxu1 %v565_v1 }
  0xf9   :  { %v508_v13 = vadd.f32 0.5, %v476_v5  ;;  %2313 = vtanh.f32 %v417_v6  ;;  %v2843_v15 = vadd.f32 %v2781_v46, %v324_v12 }
  0xfa   :  { %v2304_v16 = vpop.eup %2303  ;;  %v507_v2 = vadd.f32 0.5, %v475_v9  ;;  %v420_v17 = vmul.f32 0.5, %v2840_v10  ;;  %v566_v18 = vpack.c.bf16 %v538_v62, %v537_v8 }
  0xfb   :  { %v2306_v19 = vpop.eup %2305  ;;  %v540_v4 = vmul.f32 %v508_v13, %v2804_v11  ;;  %v478_v20 = vmul.f32 0.5, %v2304_v16  ;;  %v419_v21 = vmul.f32 0.5, %v2843_v15  ;;  %v2094_v22 = vpop.f32.mrb[18].mxu0 }
  0xfc   :  { %v539_v23 = vmul.f32 %v507_v2, %v2807_v14  ;;  %v477_v24 = vmul.f32 0.5, %v2306_v19  ;;  %2315 = vtanh.f32 %v420_v17  ;;  %v2850_v26 = vadd.f32 %v2094_v22, %v2781_v46  ;;  %v334_v27 = vpop.f32.mrb[19].mxu0  ;;  %2134 = vmatmul.mubr.bf16.gmra.mrb[4].mxu1 %v566_v18 }
  0xfd   :  { %v510_v28 = vadd.f32 0.5, %v478_v20  ;;  %2317 = vtanh.f32 %v419_v21  ;;  %v2853_v30 = vadd.f32 %v2781_v46, %v334_v27 }
  0xfe   :  { %v2308_v31 = vpop.eup %2307  ;;  %v509_v11 = vadd.f32 0.5, %v477_v24  ;;  %v422_v32 = vmul.f32 0.5, %v2850_v26  ;;  %v567_v33 = vpack.c.bf16 %v540_v4, %v539_v23 }
  0xff   :  { %v2310_v34 = vpop.eup %2309  ;;  %v542_v14 = vmul.f32 %v510_v28, %v2812_v25  ;;  %v480_v35 = vmul.f32 0.5, %v2308_v31  ;;  %v421_v36 = vmul.f32 0.5, %v2853_v30  ;;  %v2097_v37 = vpop.f32.mrb[20].mxu0 }
 0x100   :  { %v541_v38 = vmul.f32 %v509_v11, %v2815_v29  ;;  %v479_v39 = vmul.f32 0.5, %v2310_v34  ;;  %2319 = vtanh.f32 %v422_v32  ;;  %v2860_v40 = vadd.f32 %v2097_v37, %v2781_v46  ;;  %v344_v42 = vpop.f32.mrb[21].mxu0  ;;  %2137 = vmatprep.mubr.bf16.mxu1 %v567_v33 }
 0x101   :  { %v512_v43 = vadd.f32 0.5, %v480_v35  ;;  %2321 = vtanh.f32 %v421_v36  ;;  %v2863_v45 = vadd.f32 %v2781_v46, %v344_v42 }
 0x102   :  { %v2312_v47 = vpop.eup %2311  ;;  %v511_v25 = vadd.f32 0.5, %v479_v39  ;;  %v424_v48 = vmul.f32 0.5, %v2860_v40  ;;  %v568_v49 = vpack.c.bf16 %v542_v14, %v541_v38 }
 0x103   :  { %v2314_v50 = vpop.eup %2313  ;;  %v544_v29 = vmul.f32 %v512_v43, %v2820_v41  ;;  %v482_v51 = vmul.f32 0.5, %v2312_v47  ;;  %v423_v52 = vmul.f32 0.5, %v2863_v45  ;;  %v2100_v53 = vpop.f32.mrb[22].mxu0 }
 0x104   :  { %v543_v54 = vmul.f32 %v511_v25, %v2823_v44  ;;  %v481_v55 = vmul.f32 0.5, %v2314_v50  ;;  %2323 = vtanh.f32 %v424_v48  ;;  %v2870_v56 = vadd.f32 %v2100_v53, %v2781_v46  ;;  %v354_v58 = vpop.f32.mrb[23].mxu0  ;;  %2138 = vmatmul.mubr.bf16.gmra.mrb[8].mxu1 %v568_v49 }
 0x105   :  { %v514_v59 = vadd.f32 0.5, %v482_v51  ;;  %2325 = vtanh.f32 %v423_v52  ;;  %v2873_v63 = vadd.f32 %v2781_v46, %v354_v58 }
 0x106   :  { %v2316_v60 = vpop.eup %2315  ;;  %v513_v41 = vadd.f32 0.5, %v481_v55  ;;  %v426_v0 = vmul.f32 0.5, %v2870_v56  ;;  %v569_v1 = vpack.c.bf16 %v544_v29, %v543_v54 }
 0x107   :  { %v2318_v3 = vpop.eup %2317  ;;  %v546_v44 = vmul.f32 %v514_v59, %v2830_v57  ;;  %v484_v62 = vmul.f32 0.5, %v2316_v60  ;;  %v425_v5 = vmul.f32 0.5, %v2873_v63  ;;  %v2103_v6 = vpop.f32.mrb[24].mxu0 }
 0x108   :  { %v545_v7 = vmul.f32 %v513_v41, %v2833_v61  ;;  %v483_v8 = vmul.f32 0.5, %v2318_v3  ;;  %2327 = vtanh.f32 %v426_v0  ;;  %v2880_v9 = vadd.f32 %v2103_v6, %v2781_v46  ;;  %v364_v12 = vpop.f32.mrb[25].mxu0  ;;  %2141 = vmatprep.mubr.bf16.mxu1 %v569_v1 }
 0x109   :  { %v516_v13 = vadd.f32 0.5, %v484_v62  ;;  %2329 = vtanh.f32 %v425_v5  ;;  %v2883_v16 = vadd.f32 %v2781_v46, %v364_v12 }
 0x10a   :  { %v2320_v2 = vpop.eup %2319  ;;  %v515_v57 = vadd.f32 0.5, %v483_v8  ;;  %v428_v17 = vmul.f32 0.5, %v2880_v9  ;;  %v570_v18 = vpack.c.bf16 %v546_v44, %v545_v7 }
 0x10b   :  { %v2322_v19 = vpop.eup %2321  ;;  %v548_v61 = vmul.f32 %v516_v13, %v2840_v10  ;;  %v486_v4 = vmul.f32 0.5, %v2320_v2  ;;  %v427_v20 = vmul.f32 0.5, %v2883_v16  ;;  %v2106_v21 = vpop.f32.mrb[26].mxu0 }
 0x10c   :  { %v547_v22 = vmul.f32 %v515_v57, %v2843_v15  ;;  %v485_v23 = vmul.f32 0.5, %v2322_v19  ;;  %2331 = vtanh.f32 %v428_v17  ;;  %v2890_v24 = vadd.f32 %v2106_v21, %v2781_v46  ;;  %v374_v27 = vpop.f32.mrb[27].mxu0  ;;  %2142 = vmatmul.mubr.bf16.gmra.mrb[12].mxu1 %v570_v18 }
 0x10d   :  { %v518_v28 = vadd.f32 0.5, %v486_v4  ;;  %2333 = vtanh.f32 %v427_v20  ;;  %v2893_v31 = vadd.f32 %v2781_v46, %v374_v27 }
 0x10e   :  { %v2324_v11 = vpop.eup %2323  ;;  %v517_v10 = vadd.f32 0.5, %v485_v23  ;;  %v430_v32 = vmul.f32 0.5, %v2890_v24  ;;  %v571_v33 = vpack.c.bf16 %v548_v61, %v547_v22 }
 0x10f   :  { %v2326_v34 = vpop.eup %2325  ;;  %v550_v15 = vmul.f32 %v518_v28, %v2850_v26  ;;  %v488_v14 = vmul.f32 0.5, %v2324_v11  ;;  %v429_v35 = vmul.f32 0.5, %v2893_v31  ;;  %v2109_v36 = vpop.f32.mrb[28].mxu0 }
 0x110   :  { %v549_v37 = vmul.f32 %v517_v10, %v2853_v30  ;;  %v487_v38 = vmul.f32 0.5, %v2326_v34  ;;  %2335 = vtanh.f32 %v430_v32  ;;  %2145 = vmatprep.mubr.bf16.mxu1 %v571_v33  ;;  %v390_v39 = vadd.f32 %v2109_v36, %v2781_v46  ;;  %v384_v42 = vpop.f32.mrb[29].mxu0 }
 0x111   :  { %v520_v43 = vadd.f32 0.5, %v488_v14  ;;  %2337 = vtanh.f32 %v429_v35  ;;  %v385_v47 = vadd.f32 %v2781_v46, %v384_v42  ;;  %v2275_v42 = vld [vmem:[%s3448_s7] sm:$0xff]  }
 0x112   :  { %v2328_v25 = vpop.eup %2327  ;;  %v519_v48 = vadd.f32 0.5, %v487_v38  ;;  %v432_v49 = vmul.f32 0.5, %v390_v39  ;;  %v572_v26 = vpack.c.bf16 %v550_v15, %v549_v37  ;;  %v2273_v38 = vld [vmem:[%s3446_s5 + $0x30] sm:$0xff]   ;;  %2209 = vmatprep.subr.bf16.mxu1 %v2275_v42 }
 0x113   :  { %v2330_v50 = vpop.eup %2329  ;;  %v552_v29 = vmul.f32 %v520_v43, %v2860_v40  ;;  %v490_v51 = vmul.f32 0.5, %v2328_v25  ;;  %v431_v52 = vmul.f32 0.5, %v385_v47  ;;  %v2112_v30 = vpop.f32.mrb[30].mxu0  ;;  %v2276_v43 = vld [vmem:[%s3448_s7 + $0x8] sm:$0xff]   ;;  %2210 = vmatpush3.bf16.msra.mxu1 %v2275_v42  ;;  %v2278_v25 = vld [vmem:[%s3448_s7 + $0x18] sm:$0xff]  }
 0x114   :  { %v551_v53 = vmul.f32 %v519_v48, %v2863_v45  ;;  %v489_v54 = vmul.f32 0.5, %v2330_v50  ;;  %2339 = vtanh.f32 %v432_v49  ;;  %v400_v55 = vadd.f32 %v2112_v30, %v2781_v46  ;;  %v394_v58 = vpop.f32.mrb[31].mxu0  ;;  %2146 = vmatmul.mubr.bf16.gmra.mrb[16].mxu1 %v572_v26  ;;  %2211 = vmatprep.subr.bf16.mxu1 %v2276_v43  ;;  %v2279_v48 = vld [vmem:[%s3448_s7 + $0x20] sm:$0xff]  }
 0x115   :  { %v522_v59 = vadd.f32 0.5, %v490_v51  ;;  %2341 = vtanh.f32 %v431_v52  ;;  %v395_v60 = vadd.f32 %v2781_v46, %v394_v58  ;;  %v2938_v49 = vld [vmem:[%s3449_s4] ss:$0 sm:$0xff] }
 0x116   :  { %v2332_v41 = vpop.eup %2331  ;;  %v521_v0 = vadd.f32 0.5, %v489_v54  ;;  %v434_v1 = vmul.f32 0.5, %v400_v55  ;;  %v573_v3 = vpack.c.bf16 %v552_v29, %v551_v53 }
 0x117   :  { %v2334_v40 = vpop.eup %2333  ;;  %v554_v44 = vmul.f32 %v522_v59, %v2870_v56  ;;  %v492_v62 = vmul.f32 0.5, %v2332_v41  ;;  %v433_v5 = vmul.f32 0.5, %v395_v60  ;;  %2212 = vmatpush3.bf16.msra.mxu1 %v2276_v43 }
 0x118   :  { %v553_v45 = vmul.f32 %v521_v0, %v2873_v63  ;;  %v491_v6 = vmul.f32 0.5, %v2334_v40  ;;  %2343 = vtanh.f32 %v434_v1  ;;  %2149 = vmatprep.mubr.bf16.mxu1 %v573_v3 }
 0x119   :  { %v524_v7 = vadd.f32 0.5, %v492_v62  ;;  %2345 = vtanh.f32 %v433_v5 }
 0x11a   :  { %v2336_v8 = vpop.eup %2335  ;;  %v523_v12 = vadd.f32 0.5, %v491_v6  ;;  %v574_v13 = vpack.c.bf16 %v554_v44, %v553_v45 }
 0x11b   :  { %v2338_v46 = vpop.eup %2337  ;;  %v556_v2 = vmul.f32 %v524_v7, %v2880_v9  ;;  %v494_v57 = vmul.f32 0.5, %v2336_v8 }
 0x11c   :  { %v555_v17 = vmul.f32 %v523_v12, %v2883_v16  ;;  %v493_v18 = vmul.f32 0.5, %v2338_v46  ;;  %2150 = vmatmul.mubr.bf16.gmra.mrb[20].mxu1 %v574_v13 }
 0x11d   :  { %v526_v56 = vadd.f32 0.5, %v494_v57 }
 0x11e   :  { %v2340_v19 = vpop.eup %2339  ;;  %v525_v61 = vadd.f32 0.5, %v493_v18  ;;  %v575_v63 = vpack.c.bf16 %v556_v2, %v555_v17 }
 0x11f   :  { %v2342_v4 = vpop.eup %2341  ;;  %v558_v20 = vmul.f32 %v526_v56, %v2890_v24  ;;  %v496_v21 = vmul.f32 0.5, %v2340_v19 }
 0x120   :  { %v557_v22 = vmul.f32 %v525_v61, %v2893_v31  ;;  %v495_v23 = vmul.f32 0.5, %v2342_v4  ;;  %2153 = vmatprep.mubr.bf16.mxu1 %v575_v63  ;;  %v2272_v31 = vld [vmem:[%s3446_s5 + $0x28] sm:$0xff]  }
 0x121   :  { %v528_v27 = vadd.f32 0.5, %v496_v21  ;;  %2171 = vmatprep.subr.bf16.mxu0 %v2272_v31 }
 0x122   :  { %v2344_v28 = vpop.eup %2343  ;;  %v527_v9 = vadd.f32 0.5, %v495_v23  ;;  %v576_v11 = vpack.c.bf16 %v558_v20, %v557_v22  ;;  %2172 = vmatpush3.bf16.msra.mxu0 %v2272_v31 }
 0x123   :  { %v2346_v10 = vpop.eup %2345  ;;  %v560_v16 = vmul.f32 %v528_v27, %v390_v39  ;;  %v498_v32 = vmul.f32 0.5, %v2344_v28  ;;  %2173 = vmatprep.subr.bf16.mxu0 %v2273_v38  ;;  %v2274_v39 = vld [vmem:[%s3446_s5 + $0x38] sm:$0xff]  }
 0x124   :  { %v559_v33 = vmul.f32 %v527_v9, %v385_v47  ;;  %v497_v34 = vmul.f32 0.5, %v2346_v10  ;;  %2154 = vmatmul.mubr.bf16.gmra.mrb[24].mxu1 %v576_v11  ;;  %v2277_v47 = vld [vmem:[%s3448_s7 + $0x10] sm:$0xff]  }
 0x125   :  { %v530_v15 = vadd.f32 0.5, %v498_v32  ;;  %2213 = vmatprep.subr.bf16.mxu1 %v2277_v47 }
 0x126   :  { %v529_v14 = vadd.f32 0.5, %v497_v34  ;;  %v577_v35 = vpack.c.bf16 %v560_v16, %v559_v33  ;;  %2174 = vmatpush3.bf16.msra.mxu0 %v2273_v38  ;;  %2214 = vmatpush3.bf16.msra.mxu1 %v2277_v47 }
 0x127   :  { %v562_v36 = vmul.f32 %v530_v15, %v400_v55  ;;  %2175 = vmatprep.subr.bf16.mxu0 %v2274_v39  ;;  %2215 = vmatprep.subr.bf16.mxu1 %v2278_v25 }
 0x128   :  { %v561_v24 = vmul.f32 %v529_v14, %v395_v60  ;;  %2157 = vmatprep.mubr.bf16.mxu1 %v577_v35 }
 0x12a   :  { %v578_v37 = vpack.c.bf16 %v562_v36, %v561_v24  ;;  %2176 = vmatpush3.bf16.msra.mxu0 %v2274_v39  ;;  %2216 = vmatpush3.bf16.msra.mxu1 %v2278_v25 }
 0x12b   :  { %2217 = vmatprep.subr.bf16.mxu1 %v2279_v48 }
 0x12c   :  { %2158 = vmatmul.mubr.bf16.gmra.mrb[28].mxu1 %v578_v37 }
 0x12e   :  { %2218 = vmatpush3.bf16.msra.mxu1 %v2279_v48 }
 0x1c7   :  { %v2131_v26 = vpop.f32.mrb[0].mxu1 }
 0x1c8   :  { %v693_v50 = vadd.f32 %v2131_v26, %v2938_v49  ;;  %v684_v29 = vpop.f32.mrb[1].mxu1 }
 0x1c9   :  { %v685_v51 = vadd.f32 %v2938_v49, %v684_v29  ;;  %v2132_v52 = vpop.f32.mrb[2].mxu1 }
 0x1ca   :  { %v813_v30 = vmul.f32 0.5, %v693_v50  ;;  %v696_v53 = vadd.f32 %v2132_v52, %v2938_v49  ;;  %v687_v54 = vpop.f32.mrb[3].mxu1 }
 0x1cb   :  { %v811_v55 = vmul.f32 0.5, %v685_v51  ;;  %v688_v58 = vadd.f32 %v2938_v49, %v687_v54 }
 0x1cc   :  { %2347 = vtanh.f32 %v813_v30  ;;  %v814_v59 = vmul.f32 0.5, %v696_v53 }
 0x1cd   :  { %2349 = vtanh.f32 %v811_v55  ;;  %v812_v60 = vmul.f32 0.5, %v688_v58 }
 0x1ce   :  { %2351 = vtanh.f32 %v814_v59 }
 0x1cf   :  { %2353 = vtanh.f32 %v812_v60  ;;  %v2135_v41 = vpop.f32.mrb[4].mxu1 }
 0x1d0   :  { %v2945_v0 = vadd.f32 %v2135_v41, %v2938_v49  ;;  %v700_v1 = vpop.f32.mrb[5].mxu1 }
 0x1d1   :  { %v2948_v3 = vadd.f32 %v2938_v49, %v700_v1  ;;  %v2136_v40 = vpop.f32.mrb[6].mxu1 }
 0x1d2   :  { %v817_v44 = vmul.f32 0.5, %v2945_v0  ;;  %v2952_v62 = vadd.f32 %v2136_v40, %v2938_v49  ;;  %v703_v5 = vpop.f32.mrb[7].mxu1 }
 0x1d3   :  { %v815_v45 = vmul.f32 0.5, %v2948_v3  ;;  %v2956_v6 = vadd.f32 %v2938_v49, %v703_v5 }
 0x1d4   :  { %2355 = vtanh.f32 %v817_v44  ;;  %v818_v7 = vmul.f32 0.5, %v2952_v62 }
 0x1d5   :  { %2357 = vtanh.f32 %v815_v45  ;;  %v816_v8 = vmul.f32 0.5, %v2956_v6 }
 0x1d6   :  { %v2348_v12 = vpop.eup %2347  ;;  %2359 = vtanh.f32 %v818_v7 }
 0x1d7   :  { %v2350_v13 = vpop.eup %2349  ;;  %v877_v46 = vmul.f32 0.5, %v2348_v12  ;;  %2361 = vtanh.f32 %v816_v8  ;;  %v2139_v2 = vpop.f32.mrb[8].mxu1 }
 0x1d8   :  { %v2352_v57 = vpop.eup %2351  ;;  %v875_v17 = vmul.f32 0.5, %v2350_v13  ;;  %v2961_v18 = vadd.f32 %v2139_v2, %v2938_v49  ;;  %v716_v56 = vpop.f32.mrb[9].mxu1 }
 0x1d9   :  { %v2354_v19 = vpop.eup %2353  ;;  %v909_v61 = vadd.f32 0.5, %v877_v46  ;;  %v878_v63 = vmul.f32 0.5, %v2352_v57  ;;  %v2964_v4 = vadd.f32 %v2938_v49, %v716_v56  ;;  %v2140_v20 = vpop.f32.mrb[10].mxu1 }
 0x1da   :  { %v907_v21 = vadd.f32 0.5, %v875_v17  ;;  %v876_v22 = vmul.f32 0.5, %v2354_v19  ;;  %v821_v23 = vmul.f32 0.5, %v2961_v18  ;;  %v2968_v27 = vadd.f32 %v2140_v20, %v2938_v49  ;;  %v719_v28 = vpop.f32.mrb[11].mxu1 }
 0x1db   :  { %v910_v9 = vadd.f32 0.5, %v878_v63  ;;  %v819_v11 = vmul.f32 0.5, %v2964_v4  ;;  %v2972_v10 = vadd.f32 %v2938_v49, %v719_v28  ;;  %v941_v33 = vmul.f32 %v909_v61, %v693_v50 }
 0x1dc   :  { %v908_v16 = vadd.f32 0.5, %v876_v22  ;;  %2363 = vtanh.f32 %v821_v23  ;;  %v822_v32 = vmul.f32 0.5, %v2968_v27  ;;  %v939_v35 = vmul.f32 %v907_v21, %v685_v51 }
 0x1dd   :  { %v942_v34 = vmul.f32 %v910_v9, %v696_v53  ;;  %2365 = vtanh.f32 %v819_v11  ;;  %v820_v15 = vmul.f32 0.5, %v2972_v10 }
 0x1de   :  { %v2356_v14 = vpop.eup %2355  ;;  %v940_v36 = vmul.f32 %v908_v16, %v688_v58  ;;  %2367 = vtanh.f32 %v822_v32 }
 0x1df   :  { %v2358_v24 = vpop.eup %2357  ;;  %v972_v37 = vpack.c.bf16 %v942_v34, %v941_v33  ;;  %v881_v31 = vmul.f32 0.5, %v2356_v14  ;;  %2369 = vtanh.f32 %v820_v15  ;;  %v2143_v38 = vpop.f32.mrb[12].mxu1 }
 0x1e0   :  { %v2360_v39 = vpop.eup %2359  ;;  %v879_v42 = vmul.f32 0.5, %v2358_v24  ;;  %v2977_v43 = vadd.f32 %v2143_v38, %v2938_v49  ;;  %v732_v47 = vpop.f32.mrb[13].mxu1  ;;  %v971_v25 = vpack.c.bf16 %v940_v36, %v939_v35 }
 0x1e1   :  { %v2362_v48 = vpop.eup %2361  ;;  %v913_v26 = vadd.f32 0.5, %v881_v31  ;;  %v882_v50 = vmul.f32 0.5, %v2360_v39  ;;  %v2980_v29 = vadd.f32 %v2938_v49, %v732_v47  ;;  %v2144_v51 = vpop.f32.mrb[14].mxu1 }
 0x1e2   :  { %v911_v52 = vadd.f32 0.5, %v879_v42  ;;  %v880_v30 = vmul.f32 0.5, %v2362_v48  ;;  %v825_v53 = vmul.f32 0.5, %v2977_v43  ;;  %v2984_v54 = vadd.f32 %v2144_v51, %v2938_v49  ;;  %v735_v55 = vpop.f32.mrb[15].mxu1  ;;  %2177 = vmatprep.mubr.bf16.mxu0 %v971_v25 }
 0x1e3   :  { %v914_v58 = vadd.f32 0.5, %v882_v50  ;;  %v823_v59 = vmul.f32 0.5, %v2980_v29  ;;  %v2988_v60 = vadd.f32 %v2938_v49, %v735_v55  ;;  %2178 = vmatmul.mubr.bf16.vlgmr.msra.gmra.mrb[32].mxu0 %v972_v37  ;;  %v945_v40 = vmul.f32 %v913_v26, %v2945_v0 }
 0x1e4   :  { %v912_v41 = vadd.f32 0.5, %v880_v30  ;;  %2371 = vtanh.f32 %v825_v53  ;;  %v826_v1 = vmul.f32 0.5, %v2984_v54  ;;  %v943_v7 = vmul.f32 %v911_v52, %v2948_v3 }
 0x1e5   :  { %v946_v44 = vmul.f32 %v914_v58, %v2952_v62  ;;  %2373 = vtanh.f32 %v823_v59  ;;  %v824_v5 = vmul.f32 0.5, %v2988_v60 }
 0x1e6   :  { %v2364_v45 = vpop.eup %2363  ;;  %v944_v8 = vmul.f32 %v912_v41, %v2956_v6  ;;  %2375 = vtanh.f32 %v826_v1 }
 0x1e7   :  { %v2366_v12 = vpop.eup %2365  ;;  %v885_v13 = vmul.f32 0.5, %v2364_v45  ;;  %2377 = vtanh.f32 %v824_v5  ;;  %v2147_v46 = vpop.f32.mrb[16].mxu1  ;;  %v974_v2 = vpack.c.bf16 %v946_v44, %v945_v40 }
 0x1e8   :  { %v2368_v57 = vpop.eup %2367  ;;  %v883_v17 = vmul.f32 0.5, %v2366_v12  ;;  %v2997_v0 = vadd.f32 %v2147_v46, %v2938_v49  ;;  %v748_v62 = vpop.f32.mrb[17].mxu1  ;;  %v973_v56 = vpack.c.bf16 %v944_v8, %v943_v7 }
 0x1e9   :  { %v2370_v19 = vpop.eup %2369  ;;  %v917_v61 = vadd.f32 0.5, %v885_v13  ;;  %v886_v63 = vmul.f32 0.5, %v2368_v57  ;;  %v3000_v3 = vadd.f32 %v2938_v49, %v748_v62  ;;  %v2148_v6 = vpop.f32.mrb[18].mxu1 }
 0x1ea   :  { %v915_v20 = vadd.f32 0.5, %v883_v17  ;;  %v884_v21 = vmul.f32 0.5, %v2370_v19  ;;  %v829_v22 = vmul.f32 0.5, %v2997_v0  ;;  %v3004_v23 = vadd.f32 %v2148_v6, %v2938_v49  ;;  %v751_v28 = vpop.f32.mrb[19].mxu1  ;;  %2181 = vmatprep.mubr.bf16.mxu0 %v973_v56 }
 0x1eb   :  { %v918_v9 = vadd.f32 0.5, %v886_v63  ;;  %v827_v11 = vmul.f32 0.5, %v3000_v3  ;;  %v3008_v16 = vadd.f32 %v2938_v49, %v751_v28  ;;  %2182 = vmatmul.mubr.bf16.gmra.mrb[36].mxu0 %v974_v2  ;;  %v949_v34 = vmul.f32 %v917_v61, %v2961_v18 }
 0x1ec   :  { %v916_v32 = vadd.f32 0.5, %v884_v21  ;;  %2379 = vtanh.f32 %v829_v22  ;;  %v830_v33 = vmul.f32 0.5, %v3004_v23  ;;  %v947_v36 = vmul.f32 %v915_v20, %v2964_v4 }
 0x1ed   :  { %v950_v15 = vmul.f32 %v918_v9, %v2968_v27  ;;  %2381 = vtanh.f32 %v827_v11  ;;  %v828_v14 = vmul.f32 0.5, %v3008_v16 }
 0x1ee   :  { %v2372_v35 = vpop.eup %2371  ;;  %v948_v24 = vmul.f32 %v916_v32, %v2972_v10  ;;  %2383 = vtanh.f32 %v830_v33 }
 0x1ef   :  { %v2374_v37 = vpop.eup %2373  ;;  %v889_v31 = vmul.f32 0.5, %v2372_v35  ;;  %2385 = vtanh.f32 %v828_v14  ;;  %v2151_v38 = vpop.f32.mrb[20].mxu1  ;;  %v976_v39 = vpack.c.bf16 %v950_v15, %v949_v34 }
 0x1f0   :  { %v2376_v42 = vpop.eup %2375  ;;  %v887_v47 = vmul.f32 0.5, %v2374_v37  ;;  %v3017_v18 = vadd.f32 %v2151_v38, %v2938_v49  ;;  %v764_v27 = vpop.f32.mrb[21].mxu1  ;;  %v975_v25 = vpack.c.bf16 %v948_v24, %v947_v36 }
 0x1f1   :  { %v2378_v48 = vpop.eup %2377  ;;  %v921_v26 = vadd.f32 0.5, %v889_v31  ;;  %v890_v50 = vmul.f32 0.5, %v2376_v42  ;;  %v3020_v4 = vadd.f32 %v2938_v49, %v764_v27  ;;  %v2152_v10 = vpop.f32.mrb[22].mxu1 }
 0x1f2   :  { %v919_v51 = vadd.f32 0.5, %v887_v47  ;;  %v888_v52 = vmul.f32 0.5, %v2378_v48  ;;  %v833_v30 = vmul.f32 0.5, %v3017_v18  ;;  %v3024_v53 = vadd.f32 %v2152_v10, %v2938_v49  ;;  %v767_v55 = vpop.f32.mrb[23].mxu1  ;;  %2185 = vmatprep.mubr.bf16.mxu0 %v975_v25 }
 0x1f3   :  { %v922_v58 = vadd.f32 0.5, %v890_v50  ;;  %v831_v59 = vmul.f32 0.5, %v3020_v4  ;;  %v3028_v41 = vadd.f32 %v2938_v49, %v767_v55  ;;  %2186 = vmatmul.mubr.bf16.gmra.mrb[40].mxu0 %v976_v39  ;;  %v953_v44 = vmul.f32 %v921_v26, %v2977_v43 }
 0x1f4   :  { %v920_v1 = vadd.f32 0.5, %v888_v52  ;;  %2387 = vtanh.f32 %v833_v30  ;;  %v834_v40 = vmul.f32 0.5, %v3024_v53  ;;  %v951_v8 = vmul.f32 %v919_v51, %v2980_v29 }
 0x1f5   :  { %v954_v5 = vmul.f32 %v922_v58, %v2984_v54  ;;  %2389 = vtanh.f32 %v831_v59  ;;  %v832_v45 = vmul.f32 0.5, %v3028_v41 }
 0x1f6   :  { %v2380_v7 = vpop.eup %2379  ;;  %v952_v12 = vmul.f32 %v920_v1, %v2988_v60  ;;  %2391 = vtanh.f32 %v834_v40 }
 0x1f7   :  { %v2382_v13 = vpop.eup %2381  ;;  %v893_v46 = vmul.f32 0.5, %v2380_v7  ;;  %2393 = vtanh.f32 %v832_v45  ;;  %v2155_v2 = vpop.f32.mrb[24].mxu1  ;;  %v978_v57 = vpack.c.bf16 %v954_v5, %v953_v44 }
 0x1f8   :  { %v2384_v17 = vpop.eup %2383  ;;  %v891_v62 = vmul.f32 0.5, %v2382_v13  ;;  %v3037_v43 = vadd.f32 %v2155_v2, %v2938_v49  ;;  %v780_v54 = vpop.f32.mrb[25].mxu1  ;;  %v977_v56 = vpack.c.bf16 %v952_v12, %v951_v8 }
 0x1f9   :  { %v2386_v19 = vpop.eup %2385  ;;  %v925_v61 = vadd.f32 0.5, %v893_v46  ;;  %v894_v63 = vmul.f32 0.5, %v2384_v17  ;;  %v3040_v29 = vadd.f32 %v2938_v49, %v780_v54  ;;  %v2156_v60 = vpop.f32.mrb[26].mxu1 }
 0x1fa   :  { %v923_v6 = vadd.f32 0.5, %v891_v62  ;;  %v892_v20 = vmul.f32 0.5, %v2386_v19  ;;  %v837_v21 = vmul.f32 0.5, %v3037_v43  ;;  %v3044_v22 = vadd.f32 %v2156_v60, %v2938_v49  ;;  %v783_v28 = vpop.f32.mrb[27].mxu1  ;;  %2189 = vmatprep.mubr.bf16.mxu0 %v977_v56 }
 0x1fb   :  { %v926_v9 = vadd.f32 0.5, %v894_v63  ;;  %v835_v11 = vmul.f32 0.5, %v3040_v29  ;;  %v3048_v32 = vadd.f32 %v2938_v49, %v783_v28  ;;  %2190 = vmatmul.mubr.bf16.gmra.mrb[44].mxu0 %v978_v57  ;;  %v957_v15 = vmul.f32 %v925_v61, %v2997_v0 }
 0x1fc   :  { %v924_v33 = vadd.f32 0.5, %v892_v20  ;;  %2395 = vtanh.f32 %v837_v21  ;;  %v838_v34 = vmul.f32 0.5, %v3044_v22  ;;  %v955_v24 = vmul.f32 %v923_v6, %v3000_v3 }
 0x1fd   :  { %v958_v14 = vmul.f32 %v926_v9, %v3004_v23  ;;  %2397 = vtanh.f32 %v835_v11  ;;  %v836_v35 = vmul.f32 0.5, %v3048_v32 }
 0x1fe   :  { %v2388_v36 = vpop.eup %2387  ;;  %v956_v37 = vmul.f32 %v924_v33, %v3008_v16  ;;  %2399 = vtanh.f32 %v838_v34 }
 0x1ff   :  { %v2390_v31 = vpop.eup %2389  ;;  %v897_v38 = vmul.f32 0.5, %v2388_v36  ;;  %2401 = vtanh.f32 %v836_v35  ;;  %v2159_v39 = vpop.f32.mrb[28].mxu1  ;;  %v980_v42 = vpack.c.bf16 %v958_v14, %v957_v15 }
 0x200   :  { %v2392_v47 = vpop.eup %2391  ;;  %v895_v27 = vmul.f32 0.5, %v2390_v31  ;;  %v3057_v0 = vadd.f32 %v2159_v39, %v2938_v49  ;;  %v796_v23 = vpop.f32.mrb[29].mxu1  ;;  %v979_v25 = vpack.c.bf16 %v956_v37, %v955_v24 }
 0x201   :  { %v2394_v48 = vpop.eup %2393  ;;  %v929_v26 = vadd.f32 0.5, %v897_v38  ;;  %v898_v50 = vmul.f32 0.5, %v2392_v47  ;;  %v797_v3 = vadd.f32 %v2938_v49, %v796_v23  ;;  %v2160_v10 = vpop.f32.mrb[30].mxu1  ;;  %v2281_v47 = vld [vmem:[%s3448_s7 + $0x30] sm:$0xff]  }
 0x202   :  { %v927_v16 = vadd.f32 0.5, %v895_v27  ;;  %v896_v51 = vmul.f32 0.5, %v2394_v48  ;;  %v841_v52 = vmul.f32 0.5, %v3057_v0  ;;  %v808_v30 = vadd.f32 %v2160_v10, %v2938_v49  ;;  %v799_v55 = vpop.f32.mrb[31].mxu1  ;;  %2193 = vmatprep.mubr.bf16.mxu0 %v979_v25  ;;  %v2282_v27 = vld [vmem:[%s3448_s7 + $0x38] sm:$0xff]  }
 0x203   :  { %v930_v58 = vadd.f32 0.5, %v898_v50  ;;  %v839_v59 = vmul.f32 0.5, %v797_v3  ;;  %v800_v1 = vadd.f32 %v2938_v49, %v799_v55  ;;  %2194 = vmatmul.mubr.bf16.gmra.mrb[48].mxu0 %v980_v42  ;;  %v961_v5 = vmul.f32 %v929_v26, %v3017_v18  ;;  %v2280_v42 = vld [vmem:[%s3448_s7 + $0x28] sm:$0xff]  }
 0x204   :  { %v928_v40 = vadd.f32 0.5, %v896_v51  ;;  %2403 = vtanh.f32 %v841_v52  ;;  %v842_v44 = vmul.f32 0.5, %v808_v30  ;;  %v959_v12 = vmul.f32 %v927_v16, %v3020_v4  ;;  %2219 = vmatprep.subr.bf16.mxu1 %v2280_v42 }
 0x205   :  { %v962_v45 = vmul.f32 %v930_v58, %v3024_v53  ;;  %2405 = vtanh.f32 %v839_v59  ;;  %v840_v7 = vmul.f32 0.5, %v800_v1  ;;  %2220 = vmatpush3.bf16.msra.mxu1 %v2280_v42 }
 0x206   :  { %v2396_v8 = vpop.eup %2395  ;;  %v960_v13 = vmul.f32 %v928_v40, %v3028_v41  ;;  %2407 = vtanh.f32 %v842_v44  ;;  %2221 = vmatprep.subr.bf16.mxu1 %v2281_v47 }
 0x207   :  { %v2398_v46 = vpop.eup %2397  ;;  %v901_v2 = vmul.f32 0.5, %v2396_v8  ;;  %2409 = vtanh.f32 %v840_v7  ;;  %v982_v49 = vpack.c.bf16 %v962_v45, %v961_v5 }
 0x208   :  { %v2400_v57 = vpop.eup %2399  ;;  %v899_v17 = vmul.f32 0.5, %v2398_v46  ;;  %v981_v62 = vpack.c.bf16 %v960_v13, %v959_v12 }
 0x209   :  { %v2402_v54 = vpop.eup %2401  ;;  %v933_v56 = vadd.f32 0.5, %v901_v2  ;;  %v902_v18 = vmul.f32 0.5, %v2400_v57  ;;  %2222 = vmatpush3.bf16.msra.mxu1 %v2281_v47 }
 0x20a   :  { %v931_v19 = vadd.f32 0.5, %v899_v17  ;;  %v900_v53 = vmul.f32 0.5, %v2402_v54  ;;  %2197 = vmatprep.mubr.bf16.mxu0 %v981_v62  ;;  %2223 = vmatprep.subr.bf16.mxu1 %v2282_v27 }
 0x20b   :  { %v934_v61 = vadd.f32 0.5, %v902_v18  ;;  %2198 = vmatmul.mubr.bf16.gmra.mrb[52].mxu0 %v982_v49  ;;  %v965_v4 = vmul.f32 %v933_v56, %v3037_v43 }
 0x20c   :  { %v932_v63 = vadd.f32 0.5, %v900_v53  ;;  %v963_v6 = vmul.f32 %v931_v19, %v3040_v29 }
 0x20d   :  { %v966_v41 = vmul.f32 %v934_v61, %v3044_v22  ;;  %2224 = vmatpush3.bf16.msra.mxu1 %v2282_v27 }
 0x20e   :  { %v2404_v60 = vpop.eup %2403  ;;  %v964_v20 = vmul.f32 %v932_v63, %v3048_v32 }
 0x20f   :  { %v2406_v21 = vpop.eup %2405  ;;  %v905_v28 = vmul.f32 0.5, %v2404_v60  ;;  %v984_v9 = vpack.c.bf16 %v966_v41, %v965_v4 }
 0x210   :  { %v2408_v11 = vpop.eup %2407  ;;  %v903_v33 = vmul.f32 0.5, %v2406_v21  ;;  %v983_v34 = vpack.c.bf16 %v964_v20, %v963_v6 }
 0x211   :  { %v2410_v15 = vpop.eup %2409  ;;  %v937_v14 = vadd.f32 0.5, %v905_v28  ;;  %v906_v35 = vmul.f32 0.5, %v2408_v11 }
 0x212   :  { %v935_v36 = vadd.f32 0.5, %v903_v33  ;;  %v904_v24 = vmul.f32 0.5, %v2410_v15  ;;  %2201 = vmatprep.mubr.bf16.mxu0 %v983_v34 }
 0x213   :  { %v938_v43 = vadd.f32 0.5, %v906_v35  ;;  %2202 = vmatmul.mubr.bf16.gmra.mrb[56].mxu0 %v984_v9  ;;  %v969_v37 = vmul.f32 %v937_v14, %v3057_v0  ;;  %v3084_v0 = vld [vmem:[%s3450_s6] ss:$0 sm:$0xff] }
 0x214   :  { %v936_v22 = vadd.f32 0.5, %v904_v24  ;;  %v967_v31 = vmul.f32 %v935_v36, %v797_v3 }
 0x215   :  { %v970_v29 = vmul.f32 %v938_v43, %v808_v30 }
 0x216   :  { %v968_v32 = vmul.f32 %v936_v22, %v800_v1 }
 0x217   :  { %v986_v38 = vpack.c.bf16 %v970_v29, %v969_v37 }
 0x218   :  { %v985_v39 = vpack.c.bf16 %v968_v32, %v967_v31 }
 0x21a   :  { %2205 = vmatprep.mubr.bf16.mxu0 %v985_v39 }
 0x21b   :  { %2206 = vmatmul.mubr.bf16.gmra.mrb[60].mxu0 %v986_v38 }
 0x2b6   :  { %v2179_v23 = vpop.f32.mrb[32].mxu0 }
 0x2b7   :  { %v1101_v25 = vadd.f32 %v2179_v23, %v3084_v0  ;;  %v1092_v48 = vpop.f32.mrb[33].mxu0 }
 0x2b8   :  { %v1093_v26 = vadd.f32 %v3084_v0, %v1092_v48  ;;  %v2180_v50 = vpop.f32.mrb[34].mxu0 }
 0x2b9   :  { %v1221_v3 = vmul.f32 0.5, %v1101_v25  ;;  %v1104_v10 = vadd.f32 %v2180_v50, %v3084_v0  ;;  %v1095_v16 = vpop.f32.mrb[35].mxu0 }
 0x2ba   :  { %v1219_v51 = vmul.f32 0.5, %v1093_v26  ;;  %v1096_v52 = vadd.f32 %v3084_v0, %v1095_v16 }
 0x2bb   :  { %2411 = vtanh.f32 %v1221_v3  ;;  %v1222_v30 = vmul.f32 0.5, %v1104_v10 }
 0x2bc   :  { %2413 = vtanh.f32 %v1219_v51  ;;  %v1220_v55 = vmul.f32 0.5, %v1096_v52 }
 0x2bd   :  { %2415 = vtanh.f32 %v1222_v30 }
 0x2be   :  { %2417 = vtanh.f32 %v1220_v55  ;;  %v2183_v58 = vpop.f32.mrb[36].mxu0 }
 0x2bf   :  { %v3091_v59 = vadd.f32 %v2183_v58, %v3084_v0  ;;  %v1108_v1 = vpop.f32.mrb[37].mxu0 }
 0x2c0   :  { %v3094_v40 = vadd.f32 %v3084_v0, %v1108_v1  ;;  %v2184_v44 = vpop.f32.mrb[38].mxu0 }
 0x2c1   :  { %v1225_v5 = vmul.f32 0.5, %v3091_v59  ;;  %v3098_v45 = vadd.f32 %v2184_v44, %v3084_v0  ;;  %v1111_v7 = vpop.f32.mrb[39].mxu0 }
 0x2c2   :  { %v1223_v8 = vmul.f32 0.5, %v3094_v40  ;;  %v3102_v12 = vadd.f32 %v3084_v0, %v1111_v7 }
 0x2c3   :  { %2419 = vtanh.f32 %v1225_v5  ;;  %v1226_v13 = vmul.f32 0.5, %v3098_v45 }
 0x2c4   :  { %2421 = vtanh.f32 %v1223_v8  ;;  %v1224_v46 = vmul.f32 0.5, %v3102_v12 }
 0x2c5   :  { %v2412_v2 = vpop.eup %2411  ;;  %2423 = vtanh.f32 %v1226_v13 }
 0x2c6   :  { %v2414_v49 = vpop.eup %2413  ;;  %v1285_v57 = vmul.f32 0.5, %v2412_v2  ;;  %2425 = vtanh.f32 %v1224_v46  ;;  %v2187_v17 = vpop.f32.mrb[40].mxu0 }
 0x2c7   :  { %v2416_v62 = vpop.eup %2415  ;;  %v1283_v54 = vmul.f32 0.5, %v2414_v49  ;;  %v3107_v56 = vadd.f32 %v2187_v17, %v3084_v0  ;;  %v1124_v18 = vpop.f32.mrb[41].mxu0 }
 0x2c8   :  { %v2418_v19 = vpop.eup %2417  ;;  %v1317_v53 = vadd.f32 0.5, %v1285_v57  ;;  %v1286_v61 = vmul.f32 0.5, %v2416_v62  ;;  %v3110_v63 = vadd.f32 %v3084_v0, %v1124_v18  ;;  %v2188_v4 = vpop.f32.mrb[42].mxu0 }
 0x2c9   :  { %v1315_v41 = vadd.f32 0.5, %v1283_v54  ;;  %v1284_v60 = vmul.f32 0.5, %v2418_v19  ;;  %v1229_v6 = vmul.f32 0.5, %v3107_v56  ;;  %v3114_v20 = vadd.f32 %v2188_v4, %v3084_v0  ;;  %v1127_v21 = vpop.f32.mrb[43].mxu0 }
 0x2ca   :  { %v1318_v28 = vadd.f32 0.5, %v1286_v61  ;;  %v1227_v9 = vmul.f32 0.5, %v3110_v63  ;;  %v3118_v11 = vadd.f32 %v3084_v0, %v1127_v21  ;;  %v1349_v15 = vmul.f32 %v1317_v53, %v1101_v25 }
 0x2cb   :  { %v1316_v33 = vadd.f32 0.5, %v1284_v60  ;;  %2427 = vtanh.f32 %v1229_v6  ;;  %v1230_v34 = vmul.f32 0.5, %v3114_v20  ;;  %v1347_v24 = vmul.f32 %v1315_v41, %v1093_v26 }
 0x2cc   :  { %v1350_v14 = vmul.f32 %v1318_v28, %v1104_v10  ;;  %2429 = vtanh.f32 %v1227_v9  ;;  %v1228_v35 = vmul.f32 0.5, %v3118_v11 }
 0x2cd   :  { %v2420_v36 = vpop.eup %2419  ;;  %v1348_v43 = vmul.f32 %v1316_v33, %v1096_v52  ;;  %2431 = vtanh.f32 %v1230_v34 }
 0x2ce   :  { %v2422_v22 = vpop.eup %2421  ;;  %v1380_v37 = vpack.c.bf16 %v1350_v14, %v1349_v15  ;;  %v1289_v29 = vmul.f32 0.5, %v2420_v36  ;;  %2433 = vtanh.f32 %v1228_v35  ;;  %v2191_v31 = vpop.f32.mrb[44].mxu0 }
 0x2cf   :  { %v2424_v32 = vpop.eup %2423  ;;  %v1287_v38 = vmul.f32 0.5, %v2422_v22  ;;  %v3123_v39 = vadd.f32 %v2191_v31, %v3084_v0  ;;  %v1140_v42 = vpop.f32.mrb[45].mxu0  ;;  %v1379_v47 = vpack.c.bf16 %v1348_v43, %v1347_v24 }
 0x2d0   :  { %v2426_v27 = vpop.eup %2425  ;;  %v1321_v23 = vadd.f32 0.5, %v1289_v29  ;;  %v1290_v25 = vmul.f32 0.5, %v2424_v32  ;;  %v3126_v48 = vadd.f32 %v3084_v0, %v1140_v42  ;;  %v2192_v26 = vpop.f32.mrb[46].mxu0 }
 0x2d1   :  { %v1319_v50 = vadd.f32 0.5, %v1287_v38  ;;  %v1288_v3 = vmul.f32 0.5, %v2426_v27  ;;  %v1233_v10 = vmul.f32 0.5, %v3123_v39  ;;  %v3130_v16 = vadd.f32 %v2192_v26, %v3084_v0  ;;  %v1143_v51 = vpop.f32.mrb[47].mxu0  ;;  %2225 = vmatprep.mubr.bf16.mxu1 %v1379_v47 }
 0x2d2   :  { %v1322_v52 = vadd.f32 0.5, %v1290_v25  ;;  %v1231_v30 = vmul.f32 0.5, %v3126_v48  ;;  %v3134_v55 = vadd.f32 %v3084_v0, %v1143_v51  ;;  %2226 = vmatmul.mubr.bf16.vlgmr.msra.gmra.mrb[32].mxu1 %v1380_v37  ;;  %v1353_v44 = vmul.f32 %v1321_v23, %v3091_v59 }
 0x2d3   :  { %v1320_v58 = vadd.f32 0.5, %v1288_v3  ;;  %2435 = vtanh.f32 %v1233_v10  ;;  %v1234_v1 = vmul.f32 0.5, %v3130_v16  ;;  %v1351_v13 = vmul.f32 %v1319_v50, %v3094_v40 }
 0x2d4   :  { %v1354_v5 = vmul.f32 %v1322_v52, %v3098_v45  ;;  %2437 = vtanh.f32 %v1231_v30  ;;  %v1232_v7 = vmul.f32 0.5, %v3134_v55 }
 0x2d5   :  { %v2428_v8 = vpop.eup %2427  ;;  %v1352_v46 = vmul.f32 %v1320_v58, %v3102_v12  ;;  %2439 = vtanh.f32 %v1234_v1 }
 0x2d6   :  { %v2430_v2 = vpop.eup %2429  ;;  %v1293_v49 = vmul.f32 0.5, %v2428_v8  ;;  %2441 = vtanh.f32 %v1232_v7  ;;  %v2195_v57 = vpop.f32.mrb[48].mxu0  ;;  %v1382_v17 = vpack.c.bf16 %v1354_v5, %v1353_v44 }
 0x2d7   :  { %v2432_v62 = vpop.eup %2431  ;;  %v1291_v54 = vmul.f32 0.5, %v2430_v2  ;;  %v3143_v59 = vadd.f32 %v2195_v57, %v3084_v0  ;;  %v1156_v45 = vpop.f32.mrb[49].mxu0  ;;  %v1381_v18 = vpack.c.bf16 %v1352_v46, %v1351_v13 }
 0x2d8   :  { %v2434_v19 = vpop.eup %2433  ;;  %v1325_v53 = vadd.f32 0.5, %v1293_v49  ;;  %v1294_v61 = vmul.f32 0.5, %v2432_v62  ;;  %v3146_v40 = vadd.f32 %v3084_v0, %v1156_v45  ;;  %v2196_v12 = vpop.f32.mrb[50].mxu0 }
 0x2d9   :  { %v1323_v4 = vadd.f32 0.5, %v1291_v54  ;;  %v1292_v41 = vmul.f32 0.5, %v2434_v19  ;;  %v1237_v60 = vmul.f32 0.5, %v3143_v59  ;;  %v3150_v6 = vadd.f32 %v2196_v12, %v3084_v0  ;;  %v1159_v21 = vpop.f32.mrb[51].mxu0  ;;  %2229 = vmatprep.mubr.bf16.mxu1 %v1381_v18 }
 0x2da   :  { %v1326_v28 = vadd.f32 0.5, %v1294_v61  ;;  %v1235_v9 = vmul.f32 0.5, %v3146_v40  ;;  %v3154_v33 = vadd.f32 %v3084_v0, %v1159_v21  ;;  %2230 = vmatmul.mubr.bf16.gmra.mrb[36].mxu1 %v1382_v17  ;;  %v1357_v14 = vmul.f32 %v1325_v53, %v3107_v56 }
 0x2db   :  { %v1324_v34 = vadd.f32 0.5, %v1292_v41  ;;  %2443 = vtanh.f32 %v1237_v60  ;;  %v1238_v15 = vmul.f32 0.5, %v3150_v6  ;;  %v1355_v43 = vmul.f32 %v1323_v4, %v3110_v63 }
 0x2dc   :  { %v1358_v35 = vmul.f32 %v1326_v28, %v3114_v20  ;;  %2445 = vtanh.f32 %v1235_v9  ;;  %v1236_v36 = vmul.f32 0.5, %v3154_v33 }
 0x2dd   :  { %v2436_v24 = vpop.eup %2435  ;;  %v1356_v22 = vmul.f32 %v1324_v34, %v3118_v11  ;;  %2447 = vtanh.f32 %v1238_v15 }
 0x2de   :  { %v2438_v37 = vpop.eup %2437  ;;  %v1297_v29 = vmul.f32 0.5, %v2436_v24  ;;  %2449 = vtanh.f32 %v1236_v36  ;;  %v2199_v31 = vpop.f32.mrb[52].mxu0  ;;  %v1384_v32 = vpack.c.bf16 %v1358_v35, %v1357_v14 }
 0x2df   :  { %v2440_v38 = vpop.eup %2439  ;;  %v1295_v42 = vmul.f32 0.5, %v2438_v37  ;;  %v3163_v56 = vadd.f32 %v2199_v31, %v3084_v0  ;;  %v1172_v20 = vpop.f32.mrb[53].mxu0  ;;  %v1383_v47 = vpack.c.bf16 %v1356_v22, %v1355_v43 }
 0x2e0   :  { %v2442_v27 = vpop.eup %2441  ;;  %v1329_v23 = vadd.f32 0.5, %v1297_v29  ;;  %v1298_v25 = vmul.f32 0.5, %v2440_v38  ;;  %v3166_v63 = vadd.f32 %v3084_v0, %v1172_v20  ;;  %v2200_v11 = vpop.f32.mrb[54].mxu0 }
 0x2e1   :  { %v1327_v26 = vadd.f32 0.5, %v1295_v42  ;;  %v1296_v50 = vmul.f32 0.5, %v2442_v27  ;;  %v1241_v3 = vmul.f32 0.5, %v3163_v56  ;;  %v3170_v10 = vadd.f32 %v2200_v11, %v3084_v0  ;;  %v1175_v51 = vpop.f32.mrb[55].mxu0  ;;  %2233 = vmatprep.mubr.bf16.mxu1 %v1383_v47 }
 0x2e2   :  { %v1330_v52 = vadd.f32 0.5, %v1298_v25  ;;  %v1239_v30 = vmul.f32 0.5, %v3166_v63  ;;  %v3174_v58 = vadd.f32 %v3084_v0, %v1175_v51  ;;  %2234 = vmatmul.mubr.bf16.gmra.mrb[40].mxu1 %v1384_v32  ;;  %v1361_v5 = vmul.f32 %v1329_v23, %v3123_v39 }
 0x2e3   :  { %v1328_v1 = vadd.f32 0.5, %v1296_v50  ;;  %2451 = vtanh.f32 %v1241_v3  ;;  %v1242_v44 = vmul.f32 0.5, %v3170_v10  ;;  %v1359_v46 = vmul.f32 %v1327_v26, %v3126_v48 }
 0x2e4   :  { %v1362_v7 = vmul.f32 %v1330_v52, %v3130_v16  ;;  %2453 = vtanh.f32 %v1239_v30  ;;  %v1240_v8 = vmul.f32 0.5, %v3174_v58 }
 0x2e5   :  { %v2444_v13 = vpop.eup %2443  ;;  %v1360_v2 = vmul.f32 %v1328_v1, %v3134_v55  ;;  %2455 = vtanh.f32 %v1242_v44 }
 0x2e6   :  { %v2446_v49 = vpop.eup %2445  ;;  %v1301_v57 = vmul.f32 0.5, %v2444_v13  ;;  %2457 = vtanh.f32 %v1240_v8  ;;  %v2203_v17 = vpop.f32.mrb[56].mxu0  ;;  %v1386_v62 = vpack.c.bf16 %v1362_v7, %v1361_v5 }
 0x2e7   :  { %v2448_v54 = vpop.eup %2447  ;;  %v1299_v45 = vmul.f32 0.5, %v2446_v49  ;;  %v3183_v39 = vadd.f32 %v2203_v17, %v3084_v0  ;;  %v1188_v16 = vpop.f32.mrb[57].mxu0  ;;  %v1385_v18 = vpack.c.bf16 %v1360_v2, %v1359_v46 }
 0x2e8   :  { %v2450_v19 = vpop.eup %2449  ;;  %v1333_v53 = vadd.f32 0.5, %v1301_v57  ;;  %v1302_v61 = vmul.f32 0.5, %v2448_v54  ;;  %v3186_v48 = vadd.f32 %v3084_v0, %v1188_v16  ;;  %v2204_v55 = vpop.f32.mrb[58].mxu0 }
 0x2e9   :  { %v1331_v12 = vadd.f32 0.5, %v1299_v45  ;;  %v1300_v4 = vmul.f32 0.5, %v2450_v19  ;;  %v1245_v41 = vmul.f32 0.5, %v3183_v39  ;;  %v3190_v60 = vadd.f32 %v2204_v55, %v3084_v0  ;;  %v1191_v21 = vpop.f32.mrb[59].mxu0  ;;  %2237 = vmatprep.mubr.bf16.mxu1 %v1385_v18 }
 0x2ea   :  { %v1334_v28 = vadd.f32 0.5, %v1302_v61  ;;  %v1243_v9 = vmul.f32 0.5, %v3186_v48  ;;  %v3194_v34 = vadd.f32 %v3084_v0, %v1191_v21  ;;  %2238 = vmatmul.mubr.bf16.gmra.mrb[44].mxu1 %v1386_v62  ;;  %v1365_v35 = vmul.f32 %v1333_v53, %v3143_v59 }
 0x2eb   :  { %v1332_v15 = vadd.f32 0.5, %v1300_v4  ;;  %2459 = vtanh.f32 %v1245_v41  ;;  %v1246_v14 = vmul.f32 0.5, %v3190_v60  ;;  %v1363_v22 = vmul.f32 %v1331_v12, %v3146_v40 }
 0x2ec   :  { %v1366_v36 = vmul.f32 %v1334_v28, %v3150_v6  ;;  %2461 = vtanh.f32 %v1243_v9  ;;  %v1244_v24 = vmul.f32 0.5, %v3194_v34 }
 0x2ed   :  { %v2452_v43 = vpop.eup %2451  ;;  %v1364_v37 = vmul.f32 %v1332_v15, %v3154_v33  ;;  %2463 = vtanh.f32 %v1246_v14 }
 0x2ee   :  { %v2454_v29 = vpop.eup %2453  ;;  %v1305_v31 = vmul.f32 0.5, %v2452_v43  ;;  %2465 = vtanh.f32 %v1244_v24  ;;  %v2207_v32 = vpop.f32.mrb[60].mxu0  ;;  %v1388_v38 = vpack.c.bf16 %v1366_v36, %v1365_v35 }
 0x2ef   :  { %v2456_v42 = vpop.eup %2455  ;;  %v1303_v20 = vmul.f32 0.5, %v2454_v29  ;;  %v3203_v59 = vadd.f32 %v2207_v32, %v3084_v0  ;;  %v1204_v6 = vpop.f32.mrb[61].mxu0  ;;  %v1387_v47 = vpack.c.bf16 %v1364_v37, %v1363_v22 }
 0x2f0   :  { %v2458_v27 = vpop.eup %2457  ;;  %v1337_v23 = vadd.f32 0.5, %v1305_v31  ;;  %v1306_v25 = vmul.f32 0.5, %v2456_v42  ;;  %v1205_v40 = vadd.f32 %v3084_v0, %v1204_v6  ;;  %v2208_v11 = vpop.f32.mrb[62].mxu0  ;;  %v2547_v42 = vmov 0  }
 0x2f1   :  { %v1335_v33 = vadd.f32 0.5, %v1303_v20  ;;  %v1304_v26 = vmul.f32 0.5, %v2458_v27  ;;  %v1249_v50 = vmul.f32 0.5, %v3203_v59  ;;  %v1216_v3 = vadd.f32 %v2208_v11, %v3084_v0  ;;  %v1207_v51 = vpop.f32.mrb[63].mxu0  ;;  %2241 = vmatprep.mubr.bf16.mxu1 %v1387_v47  ;;  %2258 = vset.pattern.permute.xlu0 %v2547_v42 }
 0x2f2   :  { %v1338_v52 = vadd.f32 0.5, %v1306_v25  ;;  %v1247_v30 = vmul.f32 0.5, %v1205_v40  ;;  %v1208_v1 = vadd.f32 %v3084_v0, %v1207_v51  ;;  %2242 = vmatmul.mubr.bf16.gmra.mrb[48].mxu1 %v1388_v38  ;;  %v1369_v7 = vmul.f32 %v1337_v23, %v3163_v56  ;;  %v3221_v38 = vld [vmem:[%s3451_s9] sm:$0xf] }
 0x2f3   :  { %v1336_v44 = vadd.f32 0.5, %v1304_v26  ;;  %2467 = vtanh.f32 %v1249_v50  ;;  %v1250_v5 = vmul.f32 0.5, %v1216_v3  ;;  %v1367_v2 = vmul.f32 %v1335_v33, %v3166_v63  ;;  %2061 = vmatprep.mubr.bf16.mxu0 %v3221_v38 }
 0x2f4   :  { %v1370_v8 = vmul.f32 %v1338_v52, %v3170_v10  ;;  %2469 = vtanh.f32 %v1247_v30  ;;  %v1248_v13 = vmul.f32 0.5, %v1208_v1  ;;  %v16_v20 = vstv %s3453_s10 }
 0x2f5   :  { %v2460_v46 = vpop.eup %2459  ;;  %v1368_v49 = vmul.f32 %v1336_v44, %v3174_v58  ;;  %2471 = vtanh.f32 %v1250_v5  ;;  %17 = vst [vmem:[#allocation2] sm:$0x1] %v16_v20 }
 0x2f6   :  { %v2462_v57 = vpop.eup %2461  ;;  %v1309_v17 = vmul.f32 0.5, %v2460_v46  ;;  %2473 = vtanh.f32 %v1248_v13  ;;  %v1390_v0 = vpack.c.bf16 %v1370_v8, %v1369_v7 }
 0x2f7   :  { %v2464_v62 = vpop.eup %2463  ;;  %v1307_v54 = vmul.f32 0.5, %v2462_v57  ;;  %v1389_v45 = vpack.c.bf16 %v1368_v49, %v1367_v2 }
 0x2f8   :  { %v2466_v16 = vpop.eup %2465  ;;  %v1341_v18 = vadd.f32 0.5, %v1309_v17  ;;  %v1310_v56 = vmul.f32 0.5, %v2464_v62 }
 0x2f9   :  { %v1339_v19 = vadd.f32 0.5, %v1307_v54  ;;  %v1308_v10 = vmul.f32 0.5, %v2466_v16  ;;  %2245 = vmatprep.mubr.bf16.mxu1 %v1389_v45 }
 0x2fa   :  { %v1342_v53 = vadd.f32 0.5, %v1310_v56  ;;  %2246 = vmatmul.mubr.bf16.gmra.mrb[52].mxu1 %v1390_v0  ;;  %v1373_v63 = vmul.f32 %v1341_v18, %v3183_v39 }
 0x2fb   :  { %v1340_v61 = vadd.f32 0.5, %v1308_v10  ;;  %v1371_v12 = vmul.f32 %v1339_v19, %v3186_v48 }
 0x2fc   :  { %v1374_v58 = vmul.f32 %v1342_v53, %v3190_v60 }
 0x2fd   :  { %v2468_v55 = vpop.eup %2467  ;;  %v1372_v4 = vmul.f32 %v1340_v61, %v3194_v34 }
 0x2fe   :  { %v2470_v41 = vpop.eup %2469  ;;  %v1313_v21 = vmul.f32 0.5, %v2468_v55  ;;  %v1392_v28 = vpack.c.bf16 %v1374_v58, %v1373_v63 }
 0x2ff   :  { %v2472_v9 = vpop.eup %2471  ;;  %v1311_v15 = vmul.f32 0.5, %v2470_v41  ;;  %v1391_v14 = vpack.c.bf16 %v1372_v4, %v1371_v12 }
 0x300   :  { %v2474_v35 = vpop.eup %2473  ;;  %v1345_v36 = vadd.f32 0.5, %v1313_v21  ;;  %v1314_v24 = vmul.f32 0.5, %v2472_v9 }
 0x301   :  { %v1343_v43 = vadd.f32 0.5, %v1311_v15  ;;  %v1312_v22 = vmul.f32 0.5, %v2474_v35  ;;  %2249 = vmatprep.mubr.bf16.mxu1 %v1391_v14 }
 0x302   :  { %v1346_v39 = vadd.f32 0.5, %v1314_v24  ;;  %2250 = vmatmul.mubr.bf16.gmra.mrb[56].mxu1 %v1392_v28  ;;  %v1377_v37 = vmul.f32 %v1345_v36, %v3203_v59  ;;  %v3230_v59 = vld [vmem:[%s3452_s8] ss:$0 sm:$0xff] }
 0x303   :  { %v1344_v60 = vadd.f32 0.5, %v1312_v22  ;;  %v1375_v29 = vmul.f32 %v1343_v43, %v1205_v40 }
 0x304   :  { %v1378_v48 = vmul.f32 %v1346_v39, %v1216_v3  ;;  %v1939_v3 = vld [vmem:[#allocation2] ss:$0 sm:$0xff] }
 0x305   :  { %v1376_v34 = vmul.f32 %v1344_v60, %v1208_v1  ;;  %1811 = vperm.xlu0 %2258, %v1939_v3  }
 0x306   :  { %v1394_v31 = vpack.c.bf16 %v1378_v48, %v1377_v37 }
 0x307   :  { %v1393_v32 = vpack.c.bf16 %v1376_v34, %v1375_v29 }
 0x309   :  { %2253 = vmatprep.mubr.bf16.mxu1 %v1393_v32 }
 0x30a   :  { %2254 = vmatmul.mubr.bf16.gmra.mrb[60].mxu1 %v1394_v31 }
 0x3a5   :  { %v2227_v6 = vpop.f32.mrb[32].mxu1 }
 0x3a6   :  { %v1509_v47 = vadd.f32 %v2227_v6, %v3230_v59  ;;  %v1500_v27 = vpop.f32.mrb[33].mxu1 }
 0x3a7   :  { %v1501_v23 = vadd.f32 %v3230_v59, %v1500_v27  ;;  %v2228_v25 = vpop.f32.mrb[34].mxu1 }
 0x3a8   :  { %v1629_v40 = vmul.f32 0.5, %v1509_v47  ;;  %v1512_v11 = vadd.f32 %v2228_v25, %v3230_v59  ;;  %v1503_v33 = vpop.f32.mrb[35].mxu1 }
 0x3a9   :  { %v1627_v26 = vmul.f32 0.5, %v1501_v23  ;;  %v1504_v50 = vadd.f32 %v3230_v59, %v1503_v33 }
 0x3aa   :  { %2475 = vtanh.f32 %v1629_v40  ;;  %v1630_v51 = vmul.f32 0.5, %v1512_v11 }
 0x3ab   :  { %2477 = vtanh.f32 %v1627_v26  ;;  %v1628_v52 = vmul.f32 0.5, %v1504_v50 }
 0x3ac   :  { %2479 = vtanh.f32 %v1630_v51 }
 0x3ad   :  { %2481 = vtanh.f32 %v1628_v52  ;;  %v2231_v30 = vpop.f32.mrb[36].mxu1 }
 0x3ae   :  { %v3237_v1 = vadd.f32 %v2231_v30, %v3230_v59  ;;  %v1516_v44 = vpop.f32.mrb[37].mxu1 }
 0x3af   :  { %v3240_v5 = vadd.f32 %v3230_v59, %v1516_v44  ;;  %v2232_v7 = vpop.f32.mrb[38].mxu1 }
 0x3b0   :  { %v1633_v8 = vmul.f32 0.5, %v3237_v1  ;;  %v3244_v13 = vadd.f32 %v2232_v7, %v3230_v59  ;;  %v1519_v46 = vpop.f32.mrb[39].mxu1 }
 0x3b1   :  { %v1631_v2 = vmul.f32 0.5, %v3240_v5  ;;  %v3248_v49 = vadd.f32 %v3230_v59, %v1519_v46 }
 0x3b2   :  { %2483 = vtanh.f32 %v1633_v8  ;;  %v1634_v57 = vmul.f32 0.5, %v3244_v13 }
 0x3b3   :  { %2485 = vtanh.f32 %v1631_v2  ;;  %v1632_v17 = vmul.f32 0.5, %v3248_v49 }
 0x3b4   :  { %v2476_v0 = vpop.eup %2475  ;;  %2487 = vtanh.f32 %v1634_v57 }
 0x3b5   :  { %v2478_v62 = vpop.eup %2477  ;;  %v1693_v54 = vmul.f32 0.5, %v2476_v0  ;;  %2489 = vtanh.f32 %v1632_v17  ;;  %v2235_v45 = vpop.f32.mrb[40].mxu1 }
 0x3b6   :  { %v2480_v16 = vpop.eup %2479  ;;  %v1691_v18 = vmul.f32 0.5, %v2478_v62  ;;  %v3253_v56 = vadd.f32 %v2235_v45, %v3230_v59  ;;  %v1532_v19 = vpop.f32.mrb[41].mxu1 }
 0x3b7   :  { %v2482_v10 = vpop.eup %2481  ;;  %v1725_v53 = vadd.f32 0.5, %v1693_v54  ;;  %v1694_v61 = vmul.f32 0.5, %v2480_v16  ;;  %v3256_v63 = vadd.f32 %v3230_v59, %v1532_v19  ;;  %v2236_v58 = vpop.f32.mrb[42].mxu1 }
 0x3b8   :  { %v1723_v55 = vadd.f32 0.5, %v1691_v18  ;;  %v1692_v12 = vmul.f32 0.5, %v2482_v10  ;;  %v1637_v4 = vmul.f32 0.5, %v3253_v56  ;;  %v3260_v41 = vadd.f32 %v2236_v58, %v3230_v59  ;;  %v1535_v21 = vpop.f32.mrb[43].mxu1 }
 0x3b9   :  { %v1726_v28 = vadd.f32 0.5, %v1694_v61  ;;  %v1635_v9 = vmul.f32 0.5, %v3256_v63  ;;  %v3264_v15 = vadd.f32 %v3230_v59, %v1535_v21  ;;  %v3267_v36 = vmul.f32 %v1725_v53, %v1509_v47 }
 0x3ba   :  { %v1724_v14 = vadd.f32 0.5, %v1692_v12  ;;  %2491 = vtanh.f32 %v1637_v4  ;;  %v1638_v35 = vmul.f32 0.5, %v3260_v41  ;;  %v3272_v39 = vmul.f32 %v1723_v55, %v1501_v23 }
 0x3bb   :  { %v3269_v24 = vmul.f32 %v1726_v28, %v1512_v11  ;;  %2493 = vtanh.f32 %v1635_v9  ;;  %v1636_v43 = vmul.f32 0.5, %v3264_v15 }
 0x3bc   :  { %v2484_v22 = vpop.eup %2483  ;;  %v3274_v60 = vmul.f32 %v1724_v14, %v1504_v50  ;;  %2495 = vtanh.f32 %v1638_v35 }
 0x3bd   :  { %v2486_v37 = vpop.eup %2485  ;;  %v1789_v48 = vpack.c.bf16 %v3269_v24, %v3267_v36  ;;  %v1697_v29 = vmul.f32 0.5, %v2484_v22  ;;  %2497 = vtanh.f32 %v1636_v43  ;;  %v2239_v34 = vpop.f32.mrb[44].mxu1 }
 0x3be   :  { %v2488_v31 = vpop.eup %2487  ;;  %v1788_v32 = vpack.c.bf16 %v3274_v60, %v3272_v39  ;;  %v1695_v42 = vmul.f32 0.5, %v2486_v37  ;;  %v3281_v20 = vadd.f32 %v2239_v34, %v3230_v59  ;;  %v1548_v6 = vpop.f32.mrb[45].mxu1 }
 0x3bf   :  { %v2490_v47 = vpop.eup %2489  ;;  %v1729_v27 = vadd.f32 0.5, %v1697_v29  ;;  %v1698_v23 = vmul.f32 0.5, %v2488_v31  ;;  %v3284_v25 = vadd.f32 %v3230_v59, %v1548_v6  ;;  %v2240_v40 = vpop.f32.mrb[46].mxu1 }
 0x3c0   :  { %v1727_v11 = vadd.f32 0.5, %v1695_v42  ;;  %v1696_v33 = vmul.f32 0.5, %v2490_v47  ;;  %v1641_v26 = vmul.f32 0.5, %v3281_v20  ;;  %v3288_v50 = vadd.f32 %v2240_v40, %v3230_v59  ;;  %v1551_v3 = vpop.f32.mrb[47].mxu1 }
 0x3c1   :  { %v1730_v51 = vadd.f32 0.5, %v1698_v23  ;;  %v1639_v52 = vmul.f32 0.5, %v3284_v25  ;;  %v3292_v30 = vadd.f32 %v3230_v59, %v1551_v3  ;;  %v3296_v8 = vmul.f32 %v1729_v27, %v3237_v1 }
 0x3c2   :  { %v1728_v44 = vadd.f32 0.5, %v1696_v33  ;;  %2499 = vtanh.f32 %v1641_v26  ;;  %v1642_v7 = vmul.f32 0.5, %v3288_v50  ;;  %v3303_v17 = vmul.f32 %v1727_v11, %v3240_v5 }
 0x3c3   :  { %v3299_v46 = vmul.f32 %v1730_v51, %v3244_v13  ;;  %2501 = vtanh.f32 %v1639_v52  ;;  %v1640_v2 = vmul.f32 0.5, %v3292_v30 }
 0x3c4   :  { %v2492_v57 = vpop.eup %2491  ;;  %v3306_v0 = vmul.f32 %v1728_v44, %v3248_v49  ;;  %2503 = vtanh.f32 %v1642_v7 }
 0x3c5   :  { %v2494_v62 = vpop.eup %2493  ;;  %v1791_v54 = vpack.c.bf16 %v3299_v46, %v3296_v8  ;;  %v1701_v1 = vmul.f32 0.5, %v2492_v57  ;;  %2505 = vtanh.f32 %v1640_v2  ;;  %v2243_v45 = vpop.f32.mrb[48].mxu1 }
 0x3c6   :  { %v2496_v13 = vpop.eup %2495  ;;  %v1790_v16 = vpack.c.bf16 %v3306_v0, %v3303_v17  ;;  %v1699_v18 = vmul.f32 0.5, %v2494_v62  ;;  %v3313_v19 = vadd.f32 %v2243_v45, %v3230_v59  ;;  %v1564_v5 = vpop.f32.mrb[49].mxu1 }
 0x3c7   :  { %v2498_v10 = vpop.eup %2497  ;;  %v1733_v49 = vadd.f32 0.5, %v1701_v1  ;;  %v1702_v53 = vmul.f32 0.5, %v2496_v13  ;;  %v3316_v61 = vadd.f32 %v3230_v59, %v1564_v5  ;;  %v2244_v58 = vpop.f32.mrb[50].mxu1 }
 0x3c8   :  { %v1731_v55 = vadd.f32 0.5, %v1699_v18  ;;  %v1700_v12 = vmul.f32 0.5, %v2498_v10  ;;  %v1645_v4 = vmul.f32 0.5, %v3313_v19  ;;  %v3320_v21 = vadd.f32 %v2244_v58, %v3230_v59  ;;  %v1567_v28 = vpop.f32.mrb[51].mxu1  ;;  %v1812_v8 = vpop.permute.xlu0 %1811 }
 0x3c9   :  { %v1734_v9 = vadd.f32 0.5, %v1702_v53  ;;  %v1643_v14 = vmul.f32 0.5, %v3316_v61  ;;  %v3324_v35 = vadd.f32 %v3230_v59, %v1567_v28  ;;  %v3328_v37 = vmul.f32 %v1733_v49, %v3253_v56 }
 0x3ca   :  { %v1732_v43 = vadd.f32 0.5, %v1700_v12  ;;  %2507 = vtanh.f32 %v1645_v4  ;;  %v1646_v22 = vmul.f32 0.5, %v3320_v21  ;;  %v3335_v42 = vmul.f32 %v1731_v55, %v3256_v63 }
 0x3cb   :  { %v3331_v29 = vmul.f32 %v1734_v9, %v3260_v41  ;;  %2509 = vtanh.f32 %v1643_v14  ;;  %v1644_v34 = vmul.f32 0.5, %v3324_v35 }
 0x3cc   :  { %v2500_v31 = vpop.eup %2499  ;;  %v3338_v6 = vmul.f32 %v1732_v43, %v3264_v15  ;;  %2511 = vtanh.f32 %v1646_v22 }
 0x3cd   :  { %v2502_v47 = vpop.eup %2501  ;;  %v1793_v27 = vpack.c.bf16 %v3331_v29, %v3328_v37  ;;  %v1705_v56 = vmul.f32 0.5, %v2500_v31  ;;  %2513 = vtanh.f32 %v1644_v34  ;;  %v2247_v23 = vpop.f32.mrb[52].mxu1 }
 0x3ce   :  { %v2504_v41 = vpop.eup %2503  ;;  %v1792_v40 = vpack.c.bf16 %v3338_v6, %v3335_v42  ;;  %v1703_v11 = vmul.f32 0.5, %v2502_v47  ;;  %v3345_v33 = vadd.f32 %v2247_v23, %v3230_v59  ;;  %v1580_v63 = vpop.f32.mrb[53].mxu1 }
 0x3cf   :  { %v2506_v26 = vpop.eup %2505  ;;  %v1737_v15 = vadd.f32 0.5, %v1705_v56  ;;  %v1706_v3 = vmul.f32 0.5, %v2504_v41  ;;  %v3348_v51 = vadd.f32 %v3230_v59, %v1580_v63  ;;  %v2248_v52 = vpop.f32.mrb[54].mxu1 }
 0x3d0   :  { %v1735_v44 = vadd.f32 0.5, %v1703_v11  ;;  %v1704_v7 = vmul.f32 0.5, %v2506_v26  ;;  %v1649_v2 = vmul.f32 0.5, %v3345_v33  ;;  %v3352_v57 = vadd.f32 %v2248_v52, %v3230_v59  ;;  %v1583_v62 = vpop.f32.mrb[55].mxu1 }
 0x3d1   :  { %v1738_v1 = vadd.f32 0.5, %v1706_v3  ;;  %v1647_v45 = vmul.f32 0.5, %v3348_v51  ;;  %v3356_v13 = vadd.f32 %v3230_v59, %v1583_v62  ;;  %v3360_v10 = vmul.f32 %v1737_v15, %v3281_v20 }
 0x3d2   :  { %v1736_v18 = vadd.f32 0.5, %v1704_v7  ;;  %2515 = vtanh.f32 %v1649_v2  ;;  %v1650_v5 = vmul.f32 0.5, %v3352_v57  ;;  %v3367_v55 = vmul.f32 %v1735_v44, %v3284_v25 }
 0x3d3   :  { %v3363_v49 = vmul.f32 %v1738_v1, %v3288_v50  ;;  %2517 = vtanh.f32 %v1647_v45  ;;  %v1648_v53 = vmul.f32 0.5, %v3356_v13 }
 0x3d4   :  { %v2508_v58 = vpop.eup %2507  ;;  %v3370_v12 = vmul.f32 %v1736_v18, %v3292_v30  ;;  %2519 = vtanh.f32 %v1650_v5 }
 0x3d5   :  { %v2510_v4 = vpop.eup %2509  ;;  %v1795_v28 = vpack.c.bf16 %v3363_v49, %v3360_v10  ;;  %v1709_v20 = vmul.f32 0.5, %v2508_v58  ;;  %2521 = vtanh.f32 %v1648_v53  ;;  %v2251_v9 = vpop.f32.mrb[56].mxu1 }
 0x3d6   :  { %v2512_v50 = vpop.eup %2511  ;;  %v1794_v14 = vpack.c.bf16 %v3370_v12, %v3367_v55  ;;  %v1707_v43 = vmul.f32 0.5, %v2510_v4  ;;  %v3377_v22 = vadd.f32 %v2251_v9, %v3230_v59  ;;  %v1596_v25 = vpop.f32.mrb[57].mxu1 }
 0x3d7   :  { %v2514_v34 = vpop.eup %2513  ;;  %v1741_v30 = vadd.f32 0.5, %v1709_v20  ;;  %v1710_v31 = vmul.f32 0.5, %v2512_v50  ;;  %v3380_v47 = vadd.f32 %v3230_v59, %v1596_v25  ;;  %v2252_v56 = vpop.f32.mrb[58].mxu1 }
 0x3d8   :  { %v1739_v23 = vadd.f32 0.5, %v1707_v43  ;;  %v1708_v41 = vmul.f32 0.5, %v2514_v34  ;;  %v1653_v11 = vmul.f32 0.5, %v3377_v22  ;;  %v3384_v63 = vadd.f32 %v2252_v56, %v3230_v59  ;;  %v1599_v26 = vpop.f32.mrb[59].mxu1 }
 0x3d9   :  { %v1742_v15 = vadd.f32 0.5, %v1710_v31  ;;  %v1651_v3 = vmul.f32 0.5, %v3380_v47  ;;  %v3388_v52 = vadd.f32 %v3230_v59, %v1599_v26  ;;  %v1773_v2 = vmul.f32 %v1741_v30, %v3313_v19 }
 0x3da   :  { %v1740_v44 = vadd.f32 0.5, %v1708_v41  ;;  %2523 = vtanh.f32 %v1653_v11  ;;  %v1654_v7 = vmul.f32 0.5, %v3384_v63  ;;  %v1771_v18 = vmul.f32 %v1739_v23, %v3316_v61 }
 0x3db   :  { %v1774_v62 = vmul.f32 %v1742_v15, %v3320_v21  ;;  %2525 = vtanh.f32 %v1651_v3  ;;  %v1652_v1 = vmul.f32 0.5, %v3388_v52 }
 0x3dc   :  { %v2516_v45 = vpop.eup %2515  ;;  %v1772_v5 = vmul.f32 %v1740_v44, %v3324_v35  ;;  %2527 = vtanh.f32 %v1654_v7 }
 0x3dd   :  { %v2518_v53 = vpop.eup %2517  ;;  %v1713_v58 = vmul.f32 0.5, %v2516_v45  ;;  %2529 = vtanh.f32 %v1652_v1  ;;  %v2255_v4 = vpop.f32.mrb[60].mxu1  ;;  %v1797_v20 = vpack.c.bf16 %v1774_v62, %v1773_v2 }
 0x3de   :  { %v2520_v9 = vpop.eup %2519  ;;  %v1711_v50 = vmul.f32 0.5, %v2518_v53  ;;  %v3397_v19 = vadd.f32 %v2255_v4, %v3230_v59  ;;  %v1612_v21 = vpop.f32.mrb[61].mxu1  ;;  %v1796_v43 = vpack.c.bf16 %v1772_v5, %v1771_v18 }
 0x3df   :  { %v2522_v25 = vpop.eup %2521  ;;  %v1745_v34 = vadd.f32 0.5, %v1713_v58  ;;  %v1714_v30 = vmul.f32 0.5, %v2520_v9  ;;  %v1613_v61 = vadd.f32 %v3230_v59, %v1612_v21  ;;  %v2256_v31 = vpop.f32.mrb[62].mxu1 }
 0x3e0   :  { %v1743_v35 = vadd.f32 0.5, %v1711_v50  ;;  %v1712_v56 = vmul.f32 0.5, %v2522_v25  ;;  %v1657_v23 = vmul.f32 0.5, %v3397_v19  ;;  %v1624_v41 = vadd.f32 %v2256_v31, %v3230_v59  ;;  %v1615_v11 = vpop.f32.mrb[63].mxu1  ;;  %2045 = vmatprep.subr.bf16.mxu0 %v1796_v43 }
 0x3e1   :  { %v1746_v26 = vadd.f32 0.5, %v1714_v30  ;;  %v1655_v15 = vmul.f32 0.5, %v1613_v61  ;;  %v1616_v3 = vadd.f32 %v3230_v59, %v1615_v11  ;;  %2046 = vmatpush3.bf16.xpose.msra.mxu0 %v1788_v32  ;;  %v1777_v2 = vmul.f32 %v1745_v34, %v3345_v33 }
 0x3e2   :  { %v1744_v44 = vadd.f32 0.5, %v1712_v56  ;;  %2531 = vtanh.f32 %v1657_v23  ;;  %v1658_v7 = vmul.f32 0.5, %v1624_v41  ;;  %2047 = vmatprep.subr.bf16.mxu0 %v1797_v20  ;;  %v1775_v18 = vmul.f32 %v1743_v35, %v3348_v51 }
 0x3e3   :  { %v1778_v62 = vmul.f32 %v1746_v26, %v3352_v57  ;;  %2533 = vtanh.f32 %v1655_v15  ;;  %v1656_v1 = vmul.f32 0.5, %v1616_v3 }
 0x3e4   :  { %v2524_v45 = vpop.eup %2523  ;;  %v1776_v5 = vmul.f32 %v1744_v44, %v3356_v13  ;;  %2535 = vtanh.f32 %v1658_v7 }
 0x3e5   :  { %v2526_v59 = vpop.eup %2525  ;;  %v1717_v53 = vmul.f32 0.5, %v2524_v45  ;;  %2537 = vtanh.f32 %v1656_v1  ;;  %v1799_v39 = vpack.c.bf16 %v1778_v62, %v1777_v2 }
 0x3e6   :  { %v2528_v60 = vpop.eup %2527  ;;  %v1715_v32 = vmul.f32 0.5, %v2526_v59  ;;  %v1798_v58 = vpack.c.bf16 %v1776_v5, %v1775_v18 }
 0x3e7   :  { %v2530_v4 = vpop.eup %2529  ;;  %v1749_v20 = vadd.f32 0.5, %v1717_v53  ;;  %v1718_v33 = vmul.f32 0.5, %v2528_v60 }
 0x3e8   :  { %v1747_v9 = vadd.f32 0.5, %v1715_v32  ;;  %v1716_v57 = vmul.f32 0.5, %v2530_v4 }
 0x3e9   :  { %v1750_v50 = vadd.f32 0.5, %v1718_v33  ;;  %2048 = vmatpush3.bf16.xpose.msra.mxu0 %v1789_v48  ;;  %v1781_v13 = vmul.f32 %v1749_v20, %v3377_v22 }
 0x3ea   :  { %v1748_v51 = vadd.f32 0.5, %v1716_v57  ;;  %2049 = vmatprep.subr.bf16.mxu0 %v1798_v58  ;;  %v1779_v25 = vmul.f32 %v1747_v9, %v3380_v47 }
 0x3eb   :  { %v1782_v21 = vmul.f32 %v1750_v50, %v3384_v63 }
 0x3ec   :  { %v2532_v43 = vpop.eup %2531  ;;  %v1780_v34 = vmul.f32 %v1748_v51, %v3388_v52 }
 0x3ed   :  { %v2534_v30 = vpop.eup %2533  ;;  %v1721_v31 = vmul.f32 0.5, %v2532_v43  ;;  %v1801_v35 = vpack.c.bf16 %v1782_v21, %v1781_v13 }
 0x3ee   :  { %v2536_v56 = vpop.eup %2535  ;;  %v1719_v23 = vmul.f32 0.5, %v2534_v30  ;;  %v1800_v11 = vpack.c.bf16 %v1780_v34, %v1779_v25 }
 0x3ef   :  { %v2538_v26 = vpop.eup %2537  ;;  %v1753_v36 = vadd.f32 0.5, %v1721_v31  ;;  %v1722_v24 = vmul.f32 0.5, %v2536_v56 }
 0x3f0   :  { %v1751_v48 = vadd.f32 0.5, %v1719_v23  ;;  %v1720_v15 = vmul.f32 0.5, %v2538_v26 }
 0x3f1   :  { %v1754_v44 = vadd.f32 0.5, %v1722_v24  ;;  %2050 = vmatpush3.bf16.xpose.msra.mxu0 %v1790_v16  ;;  %v1785_v47 = vmul.f32 %v1753_v36, %v3397_v19 }
 0x3f2   :  { %v1752_v22 = vadd.f32 0.5, %v1720_v15  ;;  %2051 = vmatprep.subr.bf16.mxu0 %v1799_v39  ;;  %v1783_v52 = vmul.f32 %v1751_v48, %v1613_v61 }
 0x3f3   :  { %v1786_v63 = vmul.f32 %v1754_v44, %v1624_v41 }
 0x3f4   :  { %v1784_v7 = vmul.f32 %v1752_v22, %v1616_v3 }
 0x3f5   :  { %v1803_v2 = vpack.c.bf16 %v1786_v63, %v1785_v47 }
 0x3f6   :  { %v1802_v62 = vpack.c.bf16 %v1784_v7, %v1783_v52 }
 0x3f9   :  { %2052 = vmatpush3.bf16.xpose.msra.mxu0 %v1791_v54 }
 0x3fa   :  { %2053 = vmatprep.subr.bf16.mxu0 %v1800_v11 }
 0x401   :  { %2054 = vmatpush3.bf16.xpose.msra.mxu0 %v1792_v40 }
 0x402   :  { %2055 = vmatprep.subr.bf16.mxu0 %v1801_v35 }
 0x409   :  { %2056 = vmatpush3.bf16.xpose.msra.mxu0 %v1793_v27 }
 0x40a   :  { %2057 = vmatprep.subr.bf16.mxu0 %v1802_v62 }
 0x411   :  { %2058 = vmatpush3.bf16.xpose.msra.mxu0 %v1794_v14 }
 0x412   :  { %2059 = vmatprep.subr.bf16.mxu0 %v1803_v2 }
 0x419   :  { %2060 = vmatpush3.bf16.xpose.msra.mxu0 %v1795_v28 }
 0x420   :  { %2062 = vmatmul.mubr.bf16.vlgmr.msra.gmra.mrb[64].mxu0 %v3221_v38 }
 0x4f3   :  { %v1848_v46 = vpop.f32.mrb[64].mxu0 }
 0x4f4   :  { %v1849_v17 = vadd.f32 %v1848_v46, %v1812_v8  ;;  %v1850_v0 = vpop.f32.mrb[65].mxu0 }
 0x4f5   :  { %v1851_v54 = vadd.f32 %v1850_v0, %v1812_v8  ;;  %v1852_v16 = vpop.f32.mrb[66].mxu0 }
 0x4f6   :  { %v1857_v37 = vand.u32 2147483647, %v1849_v17  ;;  %v1853_v29 = vpop.f32.mrb[67].mxu0  ;;  %v1855_v19 = vmax.f32 %v1849_v17, 0.0 }
 0x4f7   :  { %v1858_v42 = vand.u32 2147483647, %v1851_v54  ;;  %v1856_v41 = vmax.f32 %v1851_v54, 0.0 }
 0x4f8   :  { %v1859_v6 = vsub.f32 0.0, %v1857_v37 }
 0x4f9   :  { %v1860_v27 = vsub.f32 0.0, %v1858_v42 }
 0x4fa   :  { %v1861_v40 = vmul.f32 1.442695, %v1859_v6 }
 0x4fb   :  { %v1863_v55 = vmul.f32 1.442695, %v1860_v27 }
 0x4fc   :  { %2539 = vpow2.f32 %v1861_v40 }
 0x4fd   :  { %2541 = vpow2.f32 %v1863_v55 }
 0x506   :  { %v2540_v12 = vpop.eup %2539 }
 0x507   :  { %v2542_v10 = vpop.eup %2541  ;;  %v1865_v49 = vadd.f32 1.0, %v2540_v12 }
 0x508   :  { %v1866_v28 = vadd.f32 1.0, %v2542_v10 }
 0x509   :  { %2543 = vlog2.f32 %v1865_v49 }
 0x50a   :  { %2545 = vlog2.f32 %v1866_v28 }
 0x513   :  { %v2544_v38 = vpop.eup %2543 }
 0x514   :  { %v2546_v14 = vpop.eup %2545  ;;  %v1868_v61 = vmul.f32 0.6931472, %v2544_v38 }
 0x515   :  { %v1870_v3 = vmul.f32 0.6931472, %v2546_v14 }
 0x516   :  { %v1871_v1 = vadd.f32 %v1868_v61, %v1855_v19 }
 0x517   :  { %v1872_v45 = vadd.f32 %v1870_v3, %v1856_v41 }
 0x518   :  { %1873 = vst [vmem:[%s3454_s11] sm:$0xff] %v1871_v1 }
 0x519   :  { %1874 = vst [vmem:[%s3454_s11 + $0x8] sm:$0xff] %v1872_v45 }

</bundles_post_ra>
